<compile_context>
chip_gen: v6e
topology: v6e:2x2x1
jax: 0.10.0
libtpu: 0.0.40
codegen_flags: <defaults>
</compile_context>

<pallas_src>
import functools

import jax
import jax.numpy as jnp
from jax.experimental import pallas as pl
from jax.experimental.pallas import tpu as pltpu

IN_FEATURES = 2048          # K
OUT_FEATURES = 1000         # F (logical)
F_PAD = 1024                # F padded to a multiple of 128 for lane-dense tiles
TILE_F = 256                # weight/output tile width -> 2 MB f32 weight tiles


def linear_kernel(x_ref, wt_ref, b_ref, o_ref):
    # One output tile per grid step: out[:, j*TILE_F : (j+1)*TILE_F]
    acc = jnp.dot(x_ref[...], wt_ref[...], preferred_element_type=jnp.float32)
    o_ref[...] = (acc + b_ref[...]).astype(o_ref.dtype)


def prepare_linear_params(weight, bias):
    """One-time parameter prep (NOT on the per-call hot path).

    weight: [F, K] (PyTorch layout)  ->  wt_pad: [K, F_PAD]
    bias:   [F]                      ->  b_pad:  [1, F_PAD]
    """
    wt = weight.T                                              # [K, F]
    wt_pad = jnp.pad(wt, ((0, 0), (0, F_PAD - OUT_FEATURES)))  # [K, F_PAD]
    b_pad = jnp.pad(bias, (0, F_PAD - OUT_FEATURES)).reshape(1, F_PAD)
    return wt_pad, b_pad


@functools.partial(jax.jit, static_argnames=())
def flatten_linear(x_nchw, wt_pad, b_pad):
    """x_nchw: [N, 2048, 1, 1] f32; wt_pad: [2048, 1024]; b_pad: [1, 1024]."""
    n = x_nchw.shape[0]
    x2d = x_nchw.reshape(n, IN_FEATURES)                       # flatten(x, 1)

    out_pad = pl.pallas_call(
        linear_kernel,
        out_shape=jax.ShapeDtypeStruct((n, F_PAD), jnp.float32),
        grid=(F_PAD // TILE_F,),
        in_specs=[
            # activations: tiny (~8 KB), VMEM-resident across all grid steps
            pl.BlockSpec((n, IN_FEATURES), lambda j: (0, 0)),
            # weight: streamed in 2048 x 256 tiles, double-buffered by Pallas
            pl.BlockSpec((IN_FEATURES, TILE_F), lambda j: (0, j)),
            # bias: co-tiled along F, each 1 KB chunk fetched exactly once
            pl.BlockSpec((1, TILE_F), lambda j: (0, j)),
        ],
        out_specs=pl.BlockSpec((n, TILE_F), lambda j: (0, j)),
        compiler_params=pltpu.CompilerParams(
            dimension_semantics=("parallel",),   # independent F tiles -> megacore
            vmem_limit_bytes=32 * 1024 * 1024,
        ),
    )(x2d, wt_pad, b_pad)

    # Drop the 24 padded output features (tiny fused slice).
    return out_pad[:, :OUT_FEATURES]


if __name__ == "__main__":
    key = jax.random.PRNGKey(0)
    kx, kw, kb = jax.random.split(key, 3)

    # Module used N=1; use a small batch of 2. Feature dims fixed by the module.
    x = jax.random.normal(kx, (2, IN_FEATURES, 1, 1), dtype=jnp.float32)

    # Deterministic init mimicking nn.Linear's uniform(-1/sqrt(fan_in), 1/sqrt(fan_in)).
    bound = 1.0 / jnp.sqrt(jnp.float32(IN_FEATURES))
    weight = jax.random.uniform(
        kw, (OUT_FEATURES, IN_FEATURES), dtype=jnp.float32, minval=-bound, maxval=bound
    )
    bias = jax.random.uniform(
        kb, (OUT_FEATURES,), dtype=jnp.float32, minval=-bound, maxval=bound
    )

    # One-time parameter prep (transpose + pad happen once, not per call).
    wt_pad, b_pad = prepare_linear_params(weight, bias)
    wt_pad, b_pad = jax.block_until_ready((wt_pad, b_pad))

    out = flatten_linear(x, wt_pad, b_pad)
    out = jax.block_until_ready(out)

    # Cross-check against plain JAX reference.
    ref = x.reshape(x.shape[0], -1) @ weight.T + bias
    assert out.shape == (2, OUT_FEATURES)
    assert jnp.allclose(out, ref, atol=1e-4, rtol=1e-4)

    print("KERNEL_OK")
</pallas_src>

<mosaic_0001>
module attributes {stable_mosaic.version = 11 : i64} {
  func.func @linear_kernel(%arg0: i32, %arg1: memref<2x2048xf32, #tpu.memory_space<vmem>>, %arg2: memref<2048x256xf32, #tpu.memory_space<vmem>>, %arg3: memref<1x256xf32, #tpu.memory_space<vmem>>, %arg4: memref<2x256xf32, #tpu.memory_space<vmem>>) attributes {dimension_semantics = [#tpu.dimension_semantics<parallel>], iteration_bounds = array<i64: 4>, scalar_prefetch = 0 : i64, scratch_operands = 0 : i64, tpu.core_type = #tpu.core_type<tc>, window_params = [{pipeline_mode = #tpu.pipeline_mode<synchronous>, transform_indices = @transform_0, window_bounds = array<i64: 2, 2048>}, {transform_indices = @transform_1, window_bounds = array<i64: 2048, 256>}, {transform_indices = @transform_2, window_bounds = array<i64: 1, 256>}, {transform_indices = @transform_3, window_bounds = array<i64: 2, 256>}]} {
    %c0 = arith.constant 0 : index
    %c0_0 = arith.constant 0 : index
    %0 = vector.load %arg1[%c0, %c0_0] : memref<2x2048xf32, #tpu.memory_space<vmem>>, vector<2x2048xf32>
    %c0_1 = arith.constant 0 : index
    %c0_2 = arith.constant 0 : index
    %1 = vector.load %arg2[%c0_1, %c0_2] : memref<2048x256xf32, #tpu.memory_space<vmem>>, vector<2048x256xf32>
    %cst = arith.constant dense<0.000000e+00> : vector<2x256xf32>
    %2 = tpu.matmul %0, %1, %cst {dimension_numbers = #tpu.dot_dimension_numbers<[1], [0], [0], [1], [0, 0, 1, 1], [], []>} : vector<2x2048xf32>, vector<2048x256xf32>, vector<2x256xf32> -> vector<2x256xf32>
    %c0_3 = arith.constant 0 : index
    %c0_4 = arith.constant 0 : index
    %3 = vector.load %arg3[%c0_3, %c0_4] : memref<1x256xf32, #tpu.memory_space<vmem>>, vector<1x256xf32>
    %4 = vector.broadcast %3 : vector<1x256xf32> to vector<2x256xf32>
    %5 = arith.addf %2, %4 : vector<2x256xf32>
    %c0_5 = arith.constant 0 : index
    %c0_6 = arith.constant 0 : index
    %6 = vector.load %arg4[%c0_5, %c0_6] : memref<2x256xf32, #tpu.memory_space<vmem>>, vector<2x256xf32>
    tpu.vector_store %arg4[%c0_5, %c0_6], %5 {strides = array<i32>} : memref<2x256xf32, #tpu.memory_space<vmem>>, vector<2x256xf32>,
    return
  }
  func.func @transform_0(%arg0: i32) -> (i32, i32) {
    %c0_i32 = arith.constant 0 : i32
    %c0_i32_0 = arith.constant 0 : i32
    %c0_i32_1 = arith.constant 0 : i32
    return %c0_i32, %c0_i32_0 : i32, i32
  }
  func.func @transform_1(%arg0: i32) -> (i32, i32) {
    %c0_i32 = arith.constant 0 : i32
    %c0_i32_0 = arith.constant 0 : i32
    return %c0_i32, %arg0 : i32, i32
  }
  func.func @transform_2(%arg0: i32) -> (i32, i32) {
    %c0_i32 = arith.constant 0 : i32
    %c0_i32_0 = arith.constant 0 : i32
    return %c0_i32, %arg0 : i32, i32
  }
  func.func @transform_3(%arg0: i32) -> (i32, i32) {
    %c0_i32 = arith.constant 0 : i32
    %c0_i32_0 = arith.constant 0 : i32
    return %c0_i32, %arg0 : i32, i32
  }
}

</mosaic_0001>

<bundles_post_ra>
// kernel: flatten_linear.1
= control target key start
LH: loop header
LB: loop body
LE: loop exit
PB: predicated region body
PF: predicated region fallthrough
CT: control target
= control target key end

     0   :  { %8 = vsyncpa [#allocation3], 0  ;;  %s2500_s0 = inlined_call_operand.vmem [shape: f32[2,2048], index: 0, kind: input, shape index: {}]   ;;  %s2501_s1 = inlined_call_operand.hbm [shape: f32[2048,1024], index: 1, kind: input, shape index: {}]   ;;  %s2502_s2 = inlined_call_operand.hbm [shape: f32[1,1024], index: 2, kind: input, shape index: {}]   ;;  %s2503_s3 = inlined_call_operand.hbm [shape: f32[2,1024], index: 3, kind: output, shape index: {}]  }
   0x1   :  { %10 = vsyncpa [#allocation3 + $0x1], 0 }
   0x2   :  { %11 = vsyncpa [#allocation6], 0 }
   0x3   :  { %13 = vsyncpa [#allocation6 + $0x1], 0 }
   0x4   :  { %14 = vsyncpa [#allocation4], 0 }
   0x5   :  { %16 = vsyncpa [#allocation4 + $0x1], 0  ;;  %s1768_s12 = smov 0   ;;  %s1770_s13 = smov 0  }
   0x6   :  { %s1772_s14 = smov 0   ;;  %s1774_s15 = smov 0  }
   0x7 LB: > { %s1789_s16 = sadd.s32 4294967295, %s1739_s15   ;;  %s1534_s17 = sadd.s32 4294967294, %s1739_s15   ;;  %s1739_s15 = sphi %s1774_s15, %s2520_s15   ;;  %s1735_s14 = sphi %s1772_s14, %s2519_s14   ;;  %s1731_s13 = sphi %s1770_s13, %s2518_s13   ;;  %s1727_s12 = sphi %s1768_s12, %s2517_s12  }
   0x8   : > { %s1793_s18 = sadd.s32 1, %s1739_s15   ;;  %s50_s19 = sadd.s32 1, %s1735_s14 }
   0x9   : > { %s47_s20 = ssub.s32 %s1739_s15, %s1793_s18  ;;  %p57_p0 = scmp.ne.s32.totalorder %s1735_s14, %s1731_s13 }
   0xa   : > { %p48_p1 = scmp.eq.s32.totalorder %s47_s20, 0  ;;  %p58_p2 = scmp.eq.s32.totalorder %s1739_s15, 0 }
   0xb   : > { %p63_p3 = scmp.ne.s32.totalorder %s1731_s13, %s1727_s12  ;;  %p64_p4 = scmp.eq.s32.totalorder %s1789_s16, 0 }
   0xc   : > { %s1805_s21 = scalar_select %p48_p1, %s1735_s14, %s50_s19  }
   0xd   : > { %p1807_p5 = por %p58_p2, %p57_p0  ;;  %p1811_p6 = por %p64_p4, %p63_p3 }
   0xe   : > { %p113_p7 = scmp.eq.s32.totalorder %s1789_s16, 3  ;;  %p119_p8 = scmp.eq.s32.totalorder %s1534_s17, 3 }
   0xf   : > { %s2507_s23 = scalar_select %p1811_p6, 1, 0 }
  0x10   : > { %p1573_p9 = scmp.lt.s32.totalorder %s1739_s15, 4  ;;  %p1817_p10 = por %p113_p7, %p57_p0 }
  0x11   : > { %p1821_p11 = por %p119_p8, %p63_p3  ;;  %s1826_s26 = sand.u32 1, %s1735_s14  }
  0x12   : > { %s2508_s24 = scalar_select %p1817_p10, 1, 0 }
  0x13   : > { %s2509_s25 = scalar_select %p1821_p11, 1, 0 }
  0x14   : > { %s1553_s27 = sshll.u32 %s1739_s15, 8  ;;  %s1537_s28 = sshll.u32 %s1826_s26, 12 }
  0x15   : > { %s1833_s4 = scalar_lea.hbm %s2501_s1, %s1553_s27  ;;  %s146_s5 = scalar_lea.vmem [#allocation2], %s1537_s28 }
  0x16   : > { %s153_s6 = sshll.u32 %s146_s5, 4  ;;  %p1837_p12 = pnand %p1573_p9, %p1807_p5  ;;  %s1841_s6 = int_to_ptr.vmem [resolvable:$true] %s153_s6 }
  0x17   : > { %s143_s8 = scalar_lea.sflag [#allocation3], %s1826_s26  ;;  %s1615_s9 = scalar_lea.hbm %s1833_s4, 65536 }
  0x18   : > { %p1616_p0 = scmp.ne.s32.totalorder %s1833_s4, %s1615_s9  ;;  %p1617_p1 = pneg %p1837_p12 }
  0x19   : > { %s1620_s17 = scalar_lea.hbm %s2501_s1, 262144  ;;  %p1621_p4 = scmp.lt.s32.totalorder %s1833_s4, %s2501_s1 }
  0x1a   : > { %p1618_p2 = pnand %p1617_p1, %p1616_p0  ;;  %p1622_p5 = scmp.lt.s32.totalorder %s1620_s17, %s1615_s9 }
  0x1c   : > { %p1619_p3 = pneg %p1618_p2  ;;  %p1623_p7 = por %p1622_p5, %p1621_p4 }
  0x1e   : > { %p1624_p8 = pnand %p1623_p7, %p1619_p3 }
  0x20   : > { %1627 = shalt.err (!%p1624_p8)
}
  0x21   : > { %s1628_s22 = scalar_lea.vmem %s1841_s6, 65536  ;;  %s1741_s27 = smov [#allocation2]  }
  0x22   : > { %p1629_p9 = scmp.ne.s32.totalorder %s1841_s6, %s1628_s22  ;;  %s1633_s28 = sshll.u32 %s1741_s27, 4  ;;  %s1634_s28 = int_to_ptr.vmem [resolvable:$false] %s1633_s28 }
  0x23   : > { %s1635_s29 = scalar_lea.vmem %s1634_s28, 131072  ;;  %p1636_p13 = scmp.lt.s32.totalorder %s1841_s6, %s1634_s28 }
  0x24   : > { %p1631_p0 = pnand %p1629_p9, %p1617_p1  ;;  %p1637_p11 = scmp.lt.s32.totalorder %s1635_s29, %s1628_s22 }
  0x26   : > { %p1632_p2 = pneg %p1631_p0  ;;  %p1638_p10 = por %p1637_p11, %p1636_p13 }
  0x28   : > { %p1639_p4 = pnand %p1638_p10, %p1632_p2 }
  0x2a   : > { %1642 = shalt.err (!%p1639_p4)
}
  0x2b   : > { %s1742_s30 = smov 1024   ;;  %s1743_s5 = smov 256  }
  0x2c   : > { %s1744_s9 = smov 16   ;;  %p180_p3 = scmp.lt.s32.totalorder %s1739_s15, 5 }
  0x2d   : > { %1565 = dma.hbm_to_vmem [thread:$0]  (!%p1837_p12), %s1833_s4, 65536, %s1841_s6, %s143_s8, %s1742_s30, %s1743_s5, %s1744_s9  }
  0x2e   : > { %s1540_s10 = sshll.u32 %s1826_s26, 1  ;;  %s1554_s11 = sshll.u32 %s1739_s15, 5 }
  0x2f   : > { %p2511_p10 = scmp.ge.s32.totalorder %s1739_s15, 1  ;;  %s1883_s22 = scalar_lea.hbm %s2502_s2, %s1554_s11 }
  0x30   : > { %s167_s27 = scalar_lea.vmem [#allocation5], %s1540_s10  ;;  %s164_s4 = scalar_lea.sflag [#allocation6], %s1826_s26 }
  0x31   : > { %p1876_p11 = pnand %p2511_p10, %p180_p3  ;;  %s175_s28 = sshll.u32 %s167_s27, 4  ;;  %s176_s28 = int_to_ptr.vmem [resolvable:$true] %s175_s28 }
  0x32   : > { %s1643_s6 = scalar_lea.hbm %s1883_s22, 32  ;;  %s1648_s30 = scalar_lea.hbm %s2502_s2, 128 }
  0x33   : > { %s2512_s17 = scalar_select %p1876_p11, 1, 0 }
  0x34   : > { %p1644_p13 = scmp.ne.s32.totalorder %s1883_s22, %s1643_s6  ;;  %p1649_p8 = scmp.lt.s32.totalorder %s1883_s22, %s2502_s2 }
  0x35   : > { %p1650_p9 = scmp.lt.s32.totalorder %s1648_s30, %s1643_s6 }
  0x36   : > { %p1646_p5 = pnand %p1644_p13, %p1617_p1 }
  0x37   : > { %p1651_p0 = por %p1650_p9, %p1649_p8 }
  0x38   : > { %p1647_p7 = pneg %p1646_p5 }
  0x3a   : > { %p1652_p2 = pnand %p1651_p0, %p1647_p7 }
  0x3c   : > { %1655 = shalt.err (!%p1652_p2)
}
  0x3d   : > { %s1656_s10 = scalar_lea.vmem %s176_s28, 32  ;;  %s1745_s26 = smov [#allocation5]  }
  0x3e   : > { %p1657_p4 = scmp.ne.s32.totalorder %s176_s28, %s1656_s10  ;;  %s1661_s11 = sshll.u32 %s1745_s26, 4  ;;  %s1662_s11 = int_to_ptr.vmem [resolvable:$false] %s1661_s11 }
  0x3f   : > { %s1663_s19 = scalar_lea.vmem %s1662_s11, 64  ;;  %p1664_p13 = scmp.lt.s32.totalorder %s176_s28, %s1662_s11 }
  0x40   : > { %p1659_p3 = pnand %p1657_p4, %p1617_p1  ;;  %p1665_p5 = scmp.lt.s32.totalorder %s1663_s19, %s1656_s10 }
  0x42   : > { %p1660_p10 = pneg %p1659_p3  ;;  %p1666_p6 = por %p1665_p5, %p1664_p13 }
  0x44   : > { %p1667_p11 = pnand %p1666_p6, %p1660_p10 }
  0x46   : > { %1670 = shalt.err (!%p1667_p11)
}
  0x47   : > { %1568 = dma.hbm_to_vmem [thread:$0]  (!%p1837_p12), %s1883_s22, 32, %s176_s28, %s164_s4  }
  0x48   : > { %p2513_p7 = scmp.ne.s32.totalorder %s2512_s17, 0 }
  0x49   : > { %s1907_s20 = sand.u32 (!%p2513_p7), 1, %s1731_s13   ;;  %p2514_p1 = scmp.ne.s32.totalorder (!%p2513_p7), %s2507_s23, 0 }
  0x4a   : > { %184 = sbr.rel (%p2513_p7) target bundleno = 561 (0x231), region = 32  ;;  %s1544_s27 = sshll.u32 (!%p2513_p7), %s1907_s20, 12 }
  0x4b   : > { %s187_s6 = scalar_lea.sflag (!%p2513_p7), [#allocation3], %s1907_s20  ;;  %s1911_s8 = scalar_lea.vmem (!%p2513_p7), [#allocation2], %s1544_s27 }
  0x4f   : > { %1714 = dma.done.wait (%p2514_p1), %s187_s6, 65536  }
  0x50   : > { %1716 = vsyncadd (%p2514_p1), %s187_s6, 4294901760  ;;  %s1545_s7 = sshll.u32 %s1907_s20, 1  ;;  %s196_s17 = scalar_lea.sflag [#allocation6], %s1907_s20 }
  0x51   : > { %s1919_s22 = scalar_lea.vmem [#allocation5], %s1545_s7 }
  0x52   : > { %1718 = dma.done.wait (%p2514_p1), %s196_s17, 32  }
  0x53   : > { %1720 = vsyncadd (%p2514_p1), %s196_s17, 4294967264  ;;  %v265_v0 = vld [vmem:[%s1911_s8 + $0xf8] sm:$0xff]  ;;  %v264_v2 = vld [vmem:[%s1911_s8 + $0xf0] sm:$0xff]  ;;  %s1546_s26 = sshll.u32 %s1907_s20, 2  ;;  %s1555_s11 = sshll.u32 %s1789_s16, 6 }
  0x54   : > { %v329_v1 = vld [vmem:[%s1911_s8 + $0x2f8] sm:$0xff]  ;;  %846 = vmatprep.subr.mxu0 %v265_v0  ;;  %v328_v3 = vld [vmem:[%s1911_s8 + $0x2f0] sm:$0xff]  ;;  %v263_v4 = vld [vmem:[%s1911_s8 + $0xe8] sm:$0xff]  ;;  %s226_s19 = scalar_lea.vmem [#allocation7], %s1546_s26  ;;  %s1439_s7 = scalar_lea.hbm %s2503_s3, %s1555_s11 }
  0x55   : > { %917 = vmatprep.subr.mxu1 %v329_v1  ;;  %v327_v5 = vld [vmem:[%s1911_s8 + $0x2e8] sm:$0xff]  ;;  %847 = vmatpush1.msra.mxu0 %v264_v2  ;;  %v262_v6 = vld [vmem:[%s1911_s8 + $0xe0] sm:$0xff]  ;;  %v261_v8 = vld [vmem:[%s1911_s8 + $0xd8] sm:$0xff]  ;;  %s1441_s27 = sshll.u32 %s226_s19, 4  ;;  %s1427_s17 = scalar_lea.sflag [#allocation4], %s1907_s20  ;;  %s1442_s27 = int_to_ptr.vmem [resolvable:$true] %s1441_s27 }
  0x56   : > { %918 = vmatpush1.msra.mxu1 %v328_v3  ;;  %v326_v7 = vld [vmem:[%s1911_s8 + $0x2e0] sm:$0xff]  ;;  %848 = vmatprep.subr.mxu0 %v263_v4  ;;  %v325_v9 = vld [vmem:[%s1911_s8 + $0x2d8] sm:$0xff]  ;;  %v260_v10 = vld [vmem:[%s1911_s8 + $0xd0] sm:$0xff]  ;;  %p2515_p12 = scmp.ne.s32.totalorder %s2508_s24, 0  ;;  %s1747_s23 = smov [#allocation7]  }
  0x57   : > { %919 = vmatprep.subr.mxu1 %v327_v5  ;;  %v324_v11 = vld [vmem:[%s1911_s8 + $0x2d0] sm:$0xff]  ;;  %849 = vmatpush1.msra.mxu0 %v262_v6  ;;  %v259_v12 = vld [vmem:[%s1911_s8 + $0xc8] sm:$0xff]  ;;  %v258_v14 = vld [vmem:[%s1911_s8 + $0xc0] sm:$0xff]  ;;  %s1675_s28 = sshll.u32 %s1747_s23, 4  ;;  %s1676_s28 = int_to_ptr.vmem [resolvable:$false] %s1675_s28 }
  0x58   : > { %920 = vmatpush1.msra.mxu1 %v326_v7  ;;  %v323_v13 = vld [vmem:[%s1911_s8 + $0x2c8] sm:$0xff]  ;;  %850 = vmatprep.subr.mxu0 %v261_v8  ;;  %v322_v15 = vld [vmem:[%s1911_s8 + $0x2c0] sm:$0xff]  ;;  %v257_v16 = vld [vmem:[%s1911_s8 + $0xb8] sm:$0xff]  ;;  %s1677_s16 = scalar_lea.vmem %s1676_s28, 128  ;;  %p1678_p9 = scmp.lt.s32.totalorder %s1442_s27, %s1676_s28 }
  0x59   : > { %921 = vmatprep.subr.mxu1 %v325_v9  ;;  %851 = vmatpush1.msra.mxu0 %v260_v10  ;;  %v321_v17 = vld [vmem:[%s1911_s8 + $0x2b8] sm:$0xff]  ;;  %v256_v18 = vld [vmem:[%s1911_s8 + $0xb0] sm:$0xff]  ;;  %v255_v20 = vld [vmem:[%s1911_s8 + $0xa8] sm:$0xff] }
  0x5a   : > { %922 = vmatpush1.msra.mxu1 %v324_v11  ;;  %852 = vmatprep.subr.mxu0 %v259_v12  ;;  %v320_v19 = vld [vmem:[%s1911_s8 + $0x2b0] sm:$0xff]  ;;  %v319_v21 = vld [vmem:[%s1911_s8 + $0x2a8] sm:$0xff]  ;;  %v254_v22 = vld [vmem:[%s1911_s8 + $0xa0] sm:$0xff] }
  0x5b   : > { %923 = vmatprep.subr.mxu1 %v323_v13  ;;  %853 = vmatpush1.msra.mxu0 %v258_v14  ;;  %v318_v23 = vld [vmem:[%s1911_s8 + $0x2a0] sm:$0xff]  ;;  %v253_v24 = vld [vmem:[%s1911_s8 + $0x98] sm:$0xff]  ;;  %v252_v26 = vld [vmem:[%s1911_s8 + $0x90] sm:$0xff] }
  0x5c   : > { %924 = vmatpush1.msra.mxu1 %v322_v15  ;;  %854 = vmatprep.subr.mxu0 %v257_v16  ;;  %v317_v25 = vld [vmem:[%s1911_s8 + $0x298] sm:$0xff]  ;;  %v316_v27 = vld [vmem:[%s1911_s8 + $0x290] sm:$0xff]  ;;  %v251_v28 = vld [vmem:[%s1911_s8 + $0x88] sm:$0xff] }
  0x5d   : > { %925 = vmatprep.subr.mxu1 %v321_v17  ;;  %855 = vmatpush1.msra.mxu0 %v256_v18  ;;  %v315_v29 = vld [vmem:[%s1911_s8 + $0x288] sm:$0xff]  ;;  %v250_v30 = vld [vmem:[%s1911_s8 + $0x80] sm:$0xff]  ;;  %v249_v32 = vld [vmem:[%s1911_s8 + $0x78] sm:$0xff] }
  0x5e   : > { %926 = vmatpush1.msra.mxu1 %v320_v19  ;;  %856 = vmatprep.subr.mxu0 %v255_v20  ;;  %v314_v31 = vld [vmem:[%s1911_s8 + $0x280] sm:$0xff]  ;;  %v313_v33 = vld [vmem:[%s1911_s8 + $0x278] sm:$0xff]  ;;  %v248_v34 = vld [vmem:[%s1911_s8 + $0x70] sm:$0xff] }
  0x5f   : > { %927 = vmatprep.subr.mxu1 %v319_v21  ;;  %857 = vmatpush1.msra.mxu0 %v254_v22  ;;  %v312_v35 = vld [vmem:[%s1911_s8 + $0x270] sm:$0xff]  ;;  %v247_v36 = vld [vmem:[%s1911_s8 + $0x68] sm:$0xff]  ;;  %v246_v38 = vld [vmem:[%s1911_s8 + $0x60] sm:$0xff] }
  0x60   : > { %928 = vmatpush1.msra.mxu1 %v318_v23  ;;  %858 = vmatprep.subr.mxu0 %v253_v24  ;;  %v311_v37 = vld [vmem:[%s1911_s8 + $0x268] sm:$0xff]  ;;  %v310_v39 = vld [vmem:[%s1911_s8 + $0x260] sm:$0xff]  ;;  %v245_v40 = vld [vmem:[%s1911_s8 + $0x58] sm:$0xff] }
  0x61   : > { %929 = vmatprep.subr.mxu1 %v317_v25  ;;  %859 = vmatpush1.msra.mxu0 %v252_v26  ;;  %v309_v41 = vld [vmem:[%s1911_s8 + $0x258] sm:$0xff]  ;;  %v244_v42 = vld [vmem:[%s1911_s8 + $0x50] sm:$0xff]  ;;  %v243_v44 = vld [vmem:[%s1911_s8 + $0x48] sm:$0xff] }
  0x62   : > { %930 = vmatpush1.msra.mxu1 %v316_v27  ;;  %860 = vmatprep.subr.mxu0 %v251_v28  ;;  %v308_v43 = vld [vmem:[%s1911_s8 + $0x250] sm:$0xff]  ;;  %v307_v45 = vld [vmem:[%s1911_s8 + $0x248] sm:$0xff]  ;;  %v242_v46 = vld [vmem:[%s1911_s8 + $0x40] sm:$0xff] }
  0x63   : > { %931 = vmatprep.subr.mxu1 %v315_v29  ;;  %861 = vmatpush1.msra.mxu0 %v250_v30  ;;  %v306_v47 = vld [vmem:[%s1911_s8 + $0x240] sm:$0xff]  ;;  %v241_v48 = vld [vmem:[%s1911_s8 + $0x38] sm:$0xff]  ;;  %v240_v50 = vld [vmem:[%s1911_s8 + $0x30] sm:$0xff]  ;;  %v748_v30 = vlaneseq }
  0x64   : > { %932 = vmatpush1.msra.mxu1 %v314_v31  ;;  %862 = vmatprep.subr.mxu0 %v249_v32  ;;  %v305_v49 = vld [vmem:[%s1911_s8 + $0x238] sm:$0xff]  ;;  %v304_v51 = vld [vmem:[%s1911_s8 + $0x230] sm:$0xff]  ;;  %v239_v52 = vld [vmem:[%s1911_s8 + $0x28] sm:$0xff]  ;;  %v1746_v31 = vmov 1983009808  }
  0x65   : > { %933 = vmatprep.subr.mxu1 %v313_v33  ;;  %863 = vmatpush1.msra.mxu0 %v248_v34  ;;  %v303_v53 = vld [vmem:[%s1911_s8 + $0x228] sm:$0xff]  ;;  %v238_v54 = vld [vmem:[%s1911_s8 + $0x20] sm:$0xff]  ;;  %v237_v56 = vld [vmem:[%s1911_s8 + $0x18] sm:$0xff]  ;;  %v764_v32 = vunpack.c.l.s4 %v1746_v31 }
  0x66   : > { %934 = vmatpush1.msra.mxu1 %v312_v35  ;;  %864 = vmatprep.subr.mxu0 %v247_v36  ;;  %v302_v55 = vld [vmem:[%s1911_s8 + $0x220] sm:$0xff]  ;;  %v301_v57 = vld [vmem:[%s1911_s8 + $0x218] sm:$0xff]  ;;  %v236_v58 = vld [vmem:[%s1911_s8 + $0x10] sm:$0xff] }
  0x67   : > { %935 = vmatprep.subr.mxu1 %v311_v37  ;;  %865 = vmatpush1.msra.mxu0 %v246_v38  ;;  %v300_v59 = vld [vmem:[%s1911_s8 + $0x210] sm:$0xff]  ;;  %v235_v60 = vld [vmem:[%s1911_s8 + $0x8] sm:$0xff]  ;;  %v234_v62 = vld [vmem:[%s1911_s8] sm:$0xff] }
  0x68   : > { %936 = vmatpush1.msra.mxu1 %v310_v39  ;;  %866 = vmatprep.subr.mxu0 %v245_v40  ;;  %v299_v61 = vld [vmem:[%s1911_s8 + $0x208] sm:$0xff]  ;;  %v298_v63 = vld [vmem:[%s1911_s8 + $0x200] sm:$0xff]  ;;  %v297_v0 = vld [vmem:[%s1911_s8 + $0x1f8] sm:$0xff] }
  0x69   : > { %937 = vmatprep.subr.mxu1 %v309_v41  ;;  %867 = vmatpush1.msra.mxu0 %v244_v42  ;;  %v361_v1 = vld [vmem:[%s1911_s8 + $0x3f8] sm:$0xff]  ;;  %v296_v2 = vld [vmem:[%s1911_s8 + $0x1f0] sm:$0xff]  ;;  %v295_v4 = vld [vmem:[%s1911_s8 + $0x1e8] sm:$0xff]  ;;  %v2027_v41 = vshrl.u32 %v748_v30, 7  ;;  %v765_v42 = vunpack.c.0.s8 %v764_v32 }
  0x6a   : > { %938 = vmatpush1.msra.mxu1 %v308_v43  ;;  %868 = vmatprep.subr.mxu0 %v243_v44  ;;  %v360_v3 = vld [vmem:[%s1911_s8 + $0x3f0] sm:$0xff]  ;;  %v359_v5 = vld [vmem:[%s1911_s8 + $0x3e8] sm:$0xff]  ;;  %v294_v6 = vld [vmem:[%s1911_s8 + $0x1e0] sm:$0xff] }
  0x6b   : > { %939 = vmatprep.subr.mxu1 %v307_v45  ;;  %869 = vmatpush1.msra.mxu0 %v242_v46  ;;  %v358_v7 = vld [vmem:[%s1911_s8 + $0x3e0] sm:$0xff]  ;;  %v293_v8 = vld [vmem:[%s1911_s8 + $0x1d8] sm:$0xff]  ;;  %v292_v10 = vld [vmem:[%s1911_s8 + $0x1d0] sm:$0xff] }
  0x6c   : > { %940 = vmatpush1.msra.mxu1 %v306_v47  ;;  %870 = vmatprep.subr.mxu0 %v241_v48  ;;  %v357_v9 = vld [vmem:[%s1911_s8 + $0x3d8] sm:$0xff]  ;;  %v356_v11 = vld [vmem:[%s1911_s8 + $0x3d0] sm:$0xff]  ;;  %v291_v12 = vld [vmem:[%s1911_s8 + $0x1c8] sm:$0xff] }
  0x6d   : > { %941 = vmatprep.subr.mxu1 %v305_v49  ;;  %871 = vmatpush1.msra.mxu0 %v240_v50  ;;  %v355_v13 = vld [vmem:[%s1911_s8 + $0x3c8] sm:$0xff]  ;;  %v290_v14 = vld [vmem:[%s1911_s8 + $0x1c0] sm:$0xff]  ;;  %v289_v16 = vld [vmem:[%s1911_s8 + $0x1b8] sm:$0xff] }
  0x6e   : > { %942 = vmatpush1.msra.mxu1 %v304_v51  ;;  %872 = vmatprep.subr.mxu0 %v239_v52  ;;  %v354_v15 = vld [vmem:[%s1911_s8 + $0x3c0] sm:$0xff]  ;;  %v353_v17 = vld [vmem:[%s1911_s8 + $0x3b8] sm:$0xff]  ;;  %v288_v18 = vld [vmem:[%s1911_s8 + $0x1b0] sm:$0xff]  ;;  %v2041_v52 = vsub.s32 %v765_v42, %v2027_v41 }
  0x6f   : > { %943 = vmatprep.subr.mxu1 %v303_v53  ;;  %873 = vmatpush1.msra.mxu0 %v238_v54  ;;  %v352_v19 = vld [vmem:[%s1911_s8 + $0x3b0] sm:$0xff]  ;;  %v287_v20 = vld [vmem:[%s1911_s8 + $0x1a8] sm:$0xff]  ;;  %v286_v22 = vld [vmem:[%s1911_s8 + $0x1a0] sm:$0xff] }
  0x70   : > { %944 = vmatpush1.msra.mxu1 %v302_v55  ;;  %874 = vmatprep.subr.mxu0 %v237_v56  ;;  %v351_v21 = vld [vmem:[%s1911_s8 + $0x3a8] sm:$0xff]  ;;  %v350_v23 = vld [vmem:[%s1911_s8 + $0x3a0] sm:$0xff]  ;;  %v285_v24 = vld [vmem:[%s1911_s8 + $0x198] sm:$0xff] }
  0x71   : > { %945 = vmatprep.subr.mxu1 %v301_v57  ;;  %875 = vmatpush1.msra.mxu0 %v236_v58  ;;  %v349_v25 = vld [vmem:[%s1911_s8 + $0x398] sm:$0xff]  ;;  %v284_v26 = vld [vmem:[%s1911_s8 + $0x190] sm:$0xff]  ;;  %v283_v28 = vld [vmem:[%s1911_s8 + $0x188] sm:$0xff] }
  0x72   : > { %946 = vmatpush1.msra.mxu1 %v300_v59  ;;  %876 = vmatprep.subr.mxu0 %v235_v60  ;;  %v348_v27 = vld [vmem:[%s1911_s8 + $0x390] sm:$0xff]  ;;  %v347_v29 = vld [vmem:[%s1911_s8 + $0x388] sm:$0xff]  ;;  %v282_v33 = vld [vmem:[%s1911_s8 + $0x180] sm:$0xff] }
  0x73   : > { %947 = vmatprep.subr.mxu1 %v299_v61  ;;  %877 = vmatpush1.msra.mxu0 %v234_v62  ;;  %v346_v34 = vld [vmem:[%s1911_s8 + $0x380] sm:$0xff]  ;;  %v281_v35 = vld [vmem:[%s1911_s8 + $0x178] sm:$0xff]  ;;  %v280_v37 = vld [vmem:[%s1911_s8 + $0x170] sm:$0xff] }
  0x74   : > { %948 = vmatpush1.msra.mxu1 %v298_v63  ;;  %878 = vmatprep.subr.mxu0 %v297_v0  ;;  %v345_v36 = vld [vmem:[%s1911_s8 + $0x378] sm:$0xff]  ;;  %v344_v38 = vld [vmem:[%s1911_s8 + $0x370] sm:$0xff]  ;;  %v279_v39 = vld [vmem:[%s1911_s8 + $0x168] sm:$0xff] }
  0x75   : > { %949 = vmatprep.subr.mxu1 %v361_v1  ;;  %879 = vmatpush2.msra.mxu0 %v296_v2  ;;  %v343_v40 = vld [vmem:[%s1911_s8 + $0x368] sm:$0xff]  ;;  %v278_v43 = vld [vmem:[%s1911_s8 + $0x160] sm:$0xff]  ;;  %v277_v45 = vld [vmem:[%s1911_s8 + $0x158] sm:$0xff] }
  0x76   : > { %950 = vmatpush2.msra.mxu1 %v360_v3  ;;  %880 = vmatprep.subr.mxu0 %v295_v4  ;;  %v342_v44 = vld [vmem:[%s1911_s8 + $0x360] sm:$0xff]  ;;  %v341_v46 = vld [vmem:[%s1911_s8 + $0x358] sm:$0xff]  ;;  %v276_v47 = vld [vmem:[%s1911_s8 + $0x150] sm:$0xff] }
  0x77   : > { %951 = vmatprep.subr.mxu1 %v359_v5  ;;  %881 = vmatpush2.msra.mxu0 %v294_v6  ;;  %v340_v48 = vld [vmem:[%s1911_s8 + $0x350] sm:$0xff]  ;;  %v230_v49 = vld [vmem:[%s2500_s0] sm:$0xff]  ;;  %v275_v50 = vld [vmem:[%s1911_s8 + $0x148] sm:$0xff] }
  0x78   : > { %952 = vmatpush2.msra.mxu1 %v358_v7  ;;  %882 = vmatprep.subr.mxu0 %v293_v8  ;;  %v339_v51 = vld [vmem:[%s1911_s8 + $0x348] sm:$0xff]  ;;  %v274_v53 = vld [vmem:[%s1911_s8 + $0x140] sm:$0xff]  ;;  %v273_v55 = vld [vmem:[%s1911_s8 + $0x138] sm:$0xff]  ;;  %v762_v57 = vcombine.high %v230_v49, %v230_v49  ;;  %v769_v62 = vrot.slane %v230_v49, %v2041_v52 }
  0x79   : > { %953 = vmatprep.subr.mxu1 %v357_v9  ;;  %883 = vmatpush2.msra.mxu0 %v292_v10  ;;  %v338_v54 = vld [vmem:[%s1911_s8 + $0x340] sm:$0xff]  ;;  %v337_v56 = vld [vmem:[%s1911_s8 + $0x338] sm:$0xff]  ;;  %v272_v58 = vld [vmem:[%s1911_s8 + $0x130] sm:$0xff] }
  0x7a   : > { %954 = vmatpush2.msra.mxu1 %v356_v11  ;;  %884 = vmatprep.subr.mxu0 %v291_v12  ;;  %v336_v59 = vld [vmem:[%s1911_s8 + $0x330] sm:$0xff]  ;;  %v271_v60 = vld [vmem:[%s1911_s8 + $0x128] sm:$0xff]  ;;  %v270_v63 = vld [vmem:[%s1911_s8 + $0x120] sm:$0xff]  ;;  %v776_v3 = vrot.slane %v762_v57, %v2041_v52  ;;  %v777_v8 = vcombine.high %v769_v62, %v769_v62 }
  0x7b   : > { %955 = vmatprep.subr.mxu1 %v355_v13  ;;  %885 = vmatpush2.msra.mxu0 %v290_v14  ;;  %v335_v61 = vld [vmem:[%s1911_s8 + $0x328] sm:$0xff]  ;;  %v334_v0 = vld [vmem:[%s1911_s8 + $0x320] sm:$0xff]  ;;  %v269_v1 = vld [vmem:[%s1911_s8 + $0x118] sm:$0xff] }
  0x7c   : > { %956 = vmatpush2.msra.mxu1 %v354_v15  ;;  %886 = vmatprep.subr.mxu0 %v289_v16  ;;  %v333_v2 = vld [vmem:[%s1911_s8 + $0x318] sm:$0xff]  ;;  %v268_v4 = vld [vmem:[%s1911_s8 + $0x110] sm:$0xff]  ;;  %v267_v6 = vld [vmem:[%s1911_s8 + $0x108] sm:$0xff]  ;;  %v778_v11 = vcombine.high %v776_v3, %v776_v3 }
  0x7d   : > { %957 = vmatprep.subr.mxu1 %v353_v17  ;;  %887 = vmatpush2.msra.mxu0 %v288_v18  ;;  %v332_v5 = vld [vmem:[%s1911_s8 + $0x310] sm:$0xff]  ;;  %v331_v7 = vld [vmem:[%s1911_s8 + $0x308] sm:$0xff]  ;;  %v266_v9 = vld [vmem:[%s1911_s8 + $0x100] sm:$0xff] }
  0x7e   : > { %958 = vmatpush2.msra.mxu1 %v352_v19  ;;  %888 = vmatprep.subr.mxu0 %v287_v20  ;;  %v330_v10 = vld [vmem:[%s1911_s8 + $0x300] sm:$0xff]  ;;  %v393_v12 = vld [vmem:[%s1911_s8 + $0x4f8] sm:$0xff]  ;;  %v392_v14 = vld [vmem:[%s1911_s8 + $0x4f0] sm:$0xff] }
  0x7f   : > { %959 = vmatprep.subr.mxu1 %v351_v21  ;;  %889 = vmatpush2.msra.mxu0 %v286_v22  ;;  %v457_v13 = vld [vmem:[%s1911_s8 + $0x6f8] sm:$0xff]  ;;  %v456_v15 = vld [vmem:[%s1911_s8 + $0x6f0] sm:$0xff]  ;;  %v391_v16 = vld [vmem:[%s1911_s8 + $0x4e8] sm:$0xff] }
  0x80   : > { %960 = vmatpush2.msra.mxu1 %v350_v23  ;;  %890 = vmatprep.subr.mxu0 %v285_v24  ;;  %v455_v17 = vld [vmem:[%s1911_s8 + $0x6e8] sm:$0xff]  ;;  %v390_v18 = vld [vmem:[%s1911_s8 + $0x4e0] sm:$0xff]  ;;  %v389_v20 = vld [vmem:[%s1911_s8 + $0x4d8] sm:$0xff] }
  0x81   : > { %961 = vmatprep.subr.mxu1 %v349_v25  ;;  %891 = vmatpush2.msra.mxu0 %v284_v26  ;;  %v454_v19 = vld [vmem:[%s1911_s8 + $0x6e0] sm:$0xff]  ;;  %v453_v21 = vld [vmem:[%s1911_s8 + $0x6d8] sm:$0xff]  ;;  %v388_v22 = vld [vmem:[%s1911_s8 + $0x4d0] sm:$0xff] }
  0x82   : > { %962 = vmatpush2.msra.mxu1 %v348_v27  ;;  %892 = vmatprep.subr.mxu0 %v283_v28  ;;  %v452_v23 = vld [vmem:[%s1911_s8 + $0x6d0] sm:$0xff]  ;;  %v387_v24 = vld [vmem:[%s1911_s8 + $0x4c8] sm:$0xff]  ;;  %v386_v26 = vld [vmem:[%s1911_s8 + $0x4c0] sm:$0xff] }
  0x83   : > { %963 = vmatprep.subr.mxu1 %v347_v29  ;;  %893 = vmatpush2.msra.mxu0 %v282_v33  ;;  %v451_v25 = vld [vmem:[%s1911_s8 + $0x6c8] sm:$0xff]  ;;  %v450_v27 = vld [vmem:[%s1911_s8 + $0x6c0] sm:$0xff]  ;;  %v385_v28 = vld [vmem:[%s1911_s8 + $0x4b8] sm:$0xff] }
  0x84   : > { %964 = vmatpush2.msra.mxu1 %v346_v34  ;;  %894 = vmatprep.subr.mxu0 %v281_v35  ;;  %v449_v29 = vld [vmem:[%s1911_s8 + $0x6b8] sm:$0xff]  ;;  %v384_v30 = vld [vmem:[%s1911_s8 + $0x4b0] sm:$0xff]  ;;  %v383_v32 = vld [vmem:[%s1911_s8 + $0x4a8] sm:$0xff] }
  0x85   : > { %965 = vmatprep.subr.mxu1 %v345_v36  ;;  %895 = vmatpush2.msra.mxu0 %v280_v37  ;;  %v448_v31 = vld [vmem:[%s1911_s8 + $0x6b0] sm:$0xff]  ;;  %v447_v33 = vld [vmem:[%s1911_s8 + $0x6a8] sm:$0xff]  ;;  %v382_v34 = vld [vmem:[%s1911_s8 + $0x4a0] sm:$0xff] }
  0x86   : > { %966 = vmatpush2.msra.mxu1 %v344_v38  ;;  %896 = vmatprep.subr.mxu0 %v279_v39  ;;  %v446_v35 = vld [vmem:[%s1911_s8 + $0x6a0] sm:$0xff]  ;;  %v381_v36 = vld [vmem:[%s1911_s8 + $0x498] sm:$0xff]  ;;  %v380_v38 = vld [vmem:[%s1911_s8 + $0x490] sm:$0xff] }
  0x87   : > { %967 = vmatprep.subr.mxu1 %v343_v40  ;;  %897 = vmatpush2.msra.mxu0 %v278_v43  ;;  %v445_v37 = vld [vmem:[%s1911_s8 + $0x698] sm:$0xff]  ;;  %v444_v39 = vld [vmem:[%s1911_s8 + $0x690] sm:$0xff]  ;;  %v379_v40 = vld [vmem:[%s1911_s8 + $0x488] sm:$0xff] }
  0x88   : > { %968 = vmatpush2.msra.mxu1 %v342_v44  ;;  %898 = vmatprep.subr.mxu0 %v277_v45  ;;  %v443_v42 = vld [vmem:[%s1911_s8 + $0x688] sm:$0xff]  ;;  %v378_v43 = vld [vmem:[%s1911_s8 + $0x480] sm:$0xff]  ;;  %v377_v45 = vld [vmem:[%s1911_s8 + $0x478] sm:$0xff] }
  0x89   : > { %969 = vmatprep.subr.mxu1 %v341_v46  ;;  %899 = vmatpush2.msra.mxu0 %v276_v47  ;;  %v442_v44 = vld [vmem:[%s1911_s8 + $0x680] sm:$0xff]  ;;  %v441_v46 = vld [vmem:[%s1911_s8 + $0x678] sm:$0xff]  ;;  %v376_v47 = vld [vmem:[%s1911_s8 + $0x470] sm:$0xff] }
  0x8a   : > { %970 = vmatpush2.msra.mxu1 %v340_v48  ;;  %900 = vmatprep.subr.mxu0 %v275_v50  ;;  %v440_v48 = vld [vmem:[%s1911_s8 + $0x670] sm:$0xff]  ;;  %v375_v49 = vld [vmem:[%s1911_s8 + $0x468] sm:$0xff] }
  0x8b   : > { %971 = vmatprep.subr.mxu1 %v339_v51  ;;  %901 = vmatpush2.msra.mxu0 %v274_v53  ;;  %v439_v50 = vld [vmem:[%s1911_s8 + $0x668] sm:$0xff]  ;;  %v374_v51 = vld [vmem:[%s1911_s8 + $0x460] sm:$0xff]  ;;  %v436_v57 = vld [vmem:[%s1911_s8 + $0x650] sm:$0xff] }
  0x8c   : > { %972 = vmatpush2.msra.mxu1 %v338_v54  ;;  %902 = vmatprep.subr.mxu0 %v273_v55  ;;  %v438_v53 = vld [vmem:[%s1911_s8 + $0x660] sm:$0xff]  ;;  %v373_v54 = vld [vmem:[%s1911_s8 + $0x458] sm:$0xff] }
  0x8d   : > { %973 = vmatprep.subr.mxu1 %v337_v56  ;;  %903 = vmatpush2.msra.mxu0 %v272_v58  ;;  %v437_v55 = vld [vmem:[%s1911_s8 + $0x658] sm:$0xff]  ;;  %v372_v56 = vld [vmem:[%s1911_s8 + $0x450] sm:$0xff]  ;;  %v371_v58 = vld [vmem:[%s1911_s8 + $0x448] sm:$0xff] }
  0x8e   : > { %974 = vmatpush2.msra.mxu1 %v336_v59  ;;  %904 = vmatprep.subr.mxu0 %v271_v60  ;;  %v435_v59 = vld [vmem:[%s1911_s8 + $0x648] sm:$0xff]  ;;  %v370_v60 = vld [vmem:[%s1911_s8 + $0x440] sm:$0xff] }
  0x8f   : > { %975 = vmatprep.subr.mxu1 %v335_v61  ;;  %905 = vmatpush2.msra.mxu0 %v270_v63  ;;  %v434_v61 = vld [vmem:[%s1911_s8 + $0x640] sm:$0xff]  ;;  %v433_v63 = vld [vmem:[%s1911_s8 + $0x638] sm:$0xff] }
  0x90   : > { %976 = vmatpush2.msra.mxu1 %v334_v0  ;;  %906 = vmatprep.subr.mxu0 %v269_v1  ;;  %v368_v0 = vld [vmem:[%s1911_s8 + $0x430] sm:$0xff] }
  0x91   : > { %977 = vmatprep.subr.mxu1 %v333_v2  ;;  %907 = vmatpush2.msra.mxu0 %v268_v4  ;;  %v432_v1 = vld [vmem:[%s1911_s8 + $0x630] sm:$0xff]  ;;  %v367_v2 = vld [vmem:[%s1911_s8 + $0x428] sm:$0xff]  ;;  %v366_v4 = vld [vmem:[%s1911_s8 + $0x420] sm:$0xff] }
  0x92   : > { %978 = vmatpush2.msra.mxu1 %v332_v5  ;;  %908 = vmatprep.subr.mxu0 %v267_v6  ;;  %v430_v5 = vld [vmem:[%s1911_s8 + $0x620] sm:$0xff]  ;;  %v365_v6 = vld [vmem:[%s1911_s8 + $0x418] sm:$0xff] }
  0x93   : > { %979 = vmatprep.subr.mxu1 %v331_v7  ;;  %909 = vmatpush2.msra.mxu0 %v266_v9  ;;  %v429_v7 = vld [vmem:[%s1911_s8 + $0x618] sm:$0xff]  ;;  %v428_v9 = vld [vmem:[%s1911_s8 + $0x610] sm:$0xff] }
  0x94   : > { %910 = vmatprep.mubr.f32.mxu0 %v777_v8  ;;  %980 = vmatpush2.msra.mxu1 %v330_v10  ;;  %v364_v8 = vld [vmem:[%s1911_s8 + $0x410] sm:$0xff]  ;;  %v363_v10 = vld [vmem:[%s1911_s8 + $0x408] sm:$0xff] }
  0x95   : > { %911 = vmatmul.mubr.f32.vlgmr.msra.gmra.mxu0 %v769_v62  ;;  %981 = vmatprep.mubr.f32.mxu1 %v778_v11  ;;  %v369_v62 = vld [vmem:[%s1911_s8 + $0x438] sm:$0xff]  ;;  %v427_v11 = vld [vmem:[%s1911_s8 + $0x608] sm:$0xff] }
  0x96   : > { %988 = vmatprep.subr.mxu0 %v393_v12  ;;  %1059 = vmatprep.subr.mxu1 %v457_v13  ;;  %v362_v12 = vld [vmem:[%s1911_s8 + $0x400] sm:$0xff] }
  0x97   : > { %982 = vmatmul.mubr.f32.vlgmr.msra.gmra.mxu1 %v776_v3  ;;  %989 = vmatpush1.msra.mxu0 %v392_v14  ;;  %v431_v3 = vld [vmem:[%s1911_s8 + $0x628] sm:$0xff]  ;;  %v426_v13 = vld [vmem:[%s1911_s8 + $0x600] sm:$0xff]  ;;  %v425_v14 = vld [vmem:[%s1911_s8 + $0x5f8] sm:$0xff] }
  0x98   : > { %1060 = vmatpush1.msra.mxu1 %v456_v15  ;;  %990 = vmatprep.subr.mxu0 %v391_v16  ;;  %v489_v15 = vld [vmem:[%s1911_s8 + $0x7f8] sm:$0xff]  ;;  %v424_v16 = vld [vmem:[%s1911_s8 + $0x5f0] sm:$0xff] }
  0x99   : > { %1061 = vmatprep.subr.mxu1 %v455_v17  ;;  %991 = vmatpush1.msra.mxu0 %v390_v18  ;;  %v488_v17 = vld [vmem:[%s1911_s8 + $0x7f0] sm:$0xff]  ;;  %v423_v18 = vld [vmem:[%s1911_s8 + $0x5e8] sm:$0xff] }
  0x9a   : > { %1062 = vmatpush1.msra.mxu1 %v454_v19  ;;  %992 = vmatprep.subr.mxu0 %v389_v20  ;;  %v487_v19 = vld [vmem:[%s1911_s8 + $0x7e8] sm:$0xff]  ;;  %v422_v20 = vld [vmem:[%s1911_s8 + $0x5e0] sm:$0xff] }
  0x9b   : > { %1063 = vmatprep.subr.mxu1 %v453_v21  ;;  %993 = vmatpush1.msra.mxu0 %v388_v22  ;;  %v486_v21 = vld [vmem:[%s1911_s8 + $0x7e0] sm:$0xff]  ;;  %v421_v22 = vld [vmem:[%s1911_s8 + $0x5d8] sm:$0xff] }
  0x9c   : > { %1064 = vmatpush1.msra.mxu1 %v452_v23  ;;  %994 = vmatprep.subr.mxu0 %v387_v24  ;;  %v485_v23 = vld [vmem:[%s1911_s8 + $0x7d8] sm:$0xff]  ;;  %v420_v24 = vld [vmem:[%s1911_s8 + $0x5d0] sm:$0xff] }
  0x9d   : > { %1065 = vmatprep.subr.mxu1 %v451_v25  ;;  %995 = vmatpush1.msra.mxu0 %v386_v26  ;;  %v484_v25 = vld [vmem:[%s1911_s8 + $0x7d0] sm:$0xff]  ;;  %v419_v26 = vld [vmem:[%s1911_s8 + $0x5c8] sm:$0xff] }
  0x9e   : > { %1066 = vmatpush1.msra.mxu1 %v450_v27  ;;  %996 = vmatprep.subr.mxu0 %v385_v28  ;;  %v483_v27 = vld [vmem:[%s1911_s8 + $0x7c8] sm:$0xff]  ;;  %v418_v28 = vld [vmem:[%s1911_s8 + $0x5c0] sm:$0xff] }
  0x9f   : > { %1067 = vmatprep.subr.mxu1 %v449_v29  ;;  %997 = vmatpush1.msra.mxu0 %v384_v30  ;;  %v482_v29 = vld [vmem:[%s1911_s8 + $0x7c0] sm:$0xff]  ;;  %v417_v30 = vld [vmem:[%s1911_s8 + $0x5b8] sm:$0xff] }
  0xa0   : > { %1068 = vmatpush1.msra.mxu1 %v448_v31  ;;  %998 = vmatprep.subr.mxu0 %v383_v32  ;;  %v481_v31 = vld [vmem:[%s1911_s8 + $0x7b8] sm:$0xff]  ;;  %v416_v32 = vld [vmem:[%s1911_s8 + $0x5b0] sm:$0xff] }
  0xa1   : > { %1069 = vmatprep.subr.mxu1 %v447_v33  ;;  %999 = vmatpush1.msra.mxu0 %v382_v34  ;;  %v480_v33 = vld [vmem:[%s1911_s8 + $0x7b0] sm:$0xff]  ;;  %v415_v34 = vld [vmem:[%s1911_s8 + $0x5a8] sm:$0xff] }
  0xa2   : > { %1070 = vmatpush1.msra.mxu1 %v446_v35  ;;  %1000 = vmatprep.subr.mxu0 %v381_v36  ;;  %v479_v35 = vld [vmem:[%s1911_s8 + $0x7a8] sm:$0xff]  ;;  %v414_v36 = vld [vmem:[%s1911_s8 + $0x5a0] sm:$0xff] }
  0xa3   : > { %1071 = vmatprep.subr.mxu1 %v445_v37  ;;  %1001 = vmatpush1.msra.mxu0 %v380_v38  ;;  %v478_v37 = vld [vmem:[%s1911_s8 + $0x7a0] sm:$0xff]  ;;  %v413_v38 = vld [vmem:[%s1911_s8 + $0x598] sm:$0xff] }
  0xa4   : > { %1072 = vmatpush1.msra.mxu1 %v444_v39  ;;  %1002 = vmatprep.subr.mxu0 %v379_v40  ;;  %v477_v39 = vld [vmem:[%s1911_s8 + $0x798] sm:$0xff]  ;;  %v412_v40 = vld [vmem:[%s1911_s8 + $0x590] sm:$0xff] }
  0xa5   : > { %1073 = vmatprep.subr.mxu1 %v443_v42  ;;  %1003 = vmatpush1.msra.mxu0 %v378_v43  ;;  %v476_v42 = vld [vmem:[%s1911_s8 + $0x790] sm:$0xff]  ;;  %v411_v43 = vld [vmem:[%s1911_s8 + $0x588] sm:$0xff] }
  0xa6   : > { %1074 = vmatpush1.msra.mxu1 %v442_v44  ;;  %1004 = vmatprep.subr.mxu0 %v377_v45  ;;  %v475_v44 = vld [vmem:[%s1911_s8 + $0x788] sm:$0xff]  ;;  %v410_v45 = vld [vmem:[%s1911_s8 + $0x580] sm:$0xff] }
  0xa7   : > { %1075 = vmatprep.subr.mxu1 %v441_v46  ;;  %1005 = vmatpush1.msra.mxu0 %v376_v47  ;;  %v474_v46 = vld [vmem:[%s1911_s8 + $0x780] sm:$0xff]  ;;  %v409_v47 = vld [vmem:[%s1911_s8 + $0x578] sm:$0xff] }
  0xa8   : > { %1076 = vmatpush1.msra.mxu1 %v440_v48  ;;  %1006 = vmatprep.subr.mxu0 %v375_v49  ;;  %v473_v48 = vld [vmem:[%s1911_s8 + $0x778] sm:$0xff]  ;;  %v408_v49 = vld [vmem:[%s1911_s8 + $0x570] sm:$0xff] }
  0xa9   : > { %1077 = vmatprep.subr.mxu1 %v439_v50  ;;  %1007 = vmatpush1.msra.mxu0 %v374_v51  ;;  %v472_v50 = vld [vmem:[%s1911_s8 + $0x770] sm:$0xff]  ;;  %v407_v51 = vld [vmem:[%s1911_s8 + $0x568] sm:$0xff] }
  0xaa   : > { %1078 = vmatpush1.msra.mxu1 %v438_v53  ;;  %1008 = vmatprep.subr.mxu0 %v373_v54  ;;  %v471_v53 = vld [vmem:[%s1911_s8 + $0x768] sm:$0xff]  ;;  %v406_v54 = vld [vmem:[%s1911_s8 + $0x560] sm:$0xff] }
  0xab   : > { %1079 = vmatprep.subr.mxu1 %v437_v55  ;;  %1009 = vmatpush1.msra.mxu0 %v372_v56  ;;  %v470_v55 = vld [vmem:[%s1911_s8 + $0x760] sm:$0xff]  ;;  %v405_v56 = vld [vmem:[%s1911_s8 + $0x558] sm:$0xff] }
  0xac   : > { %1080 = vmatpush1.msra.mxu1 %v436_v57  ;;  %1010 = vmatprep.subr.mxu0 %v371_v58  ;;  %v469_v57 = vld [vmem:[%s1911_s8 + $0x758] sm:$0xff]  ;;  %v404_v58 = vld [vmem:[%s1911_s8 + $0x550] sm:$0xff] }
  0xad   : > { %1081 = vmatprep.subr.mxu1 %v435_v59  ;;  %1011 = vmatpush1.msra.mxu0 %v370_v60  ;;  %v468_v59 = vld [vmem:[%s1911_s8 + $0x750] sm:$0xff]  ;;  %v231_v60 = vld [vmem:[%s2500_s0 + $0x8] sm:$0xff] }
  0xae   : > { %1082 = vmatpush1.msra.mxu1 %v434_v61  ;;  %1012 = vmatprep.subr.mxu0 %v369_v62  ;;  %v403_v61 = vld [vmem:[%s1911_s8 + $0x548] sm:$0xff] }
  0xaf   : > { %1083 = vmatprep.subr.mxu1 %v433_v63  ;;  %1013 = vmatpush1.msra.mxu0 %v368_v0  ;;  %v467_v62 = vld [vmem:[%s1911_s8 + $0x748] sm:$0xff]  ;;  %v402_v63 = vld [vmem:[%s1911_s8 + $0x540] sm:$0xff] }
  0xb0   : > { %1084 = vmatpush1.msra.mxu1 %v432_v1  ;;  %1014 = vmatprep.subr.mxu0 %v367_v2  ;;  %v466_v0 = vld [vmem:[%s1911_s8 + $0x740] sm:$0xff]  ;;  %v401_v1 = vld [vmem:[%s1911_s8 + $0x538] sm:$0xff] }
  0xb1   : > { %1085 = vmatprep.subr.mxu1 %v431_v3  ;;  %1015 = vmatpush1.msra.mxu0 %v366_v4  ;;  %v465_v2 = vld [vmem:[%s1911_s8 + $0x738] sm:$0xff]  ;;  %v779_v3 = vcombine.high %v231_v60, %v231_v60  ;;  %v400_v4 = vld [vmem:[%s1911_s8 + $0x530] sm:$0xff] }
  0xb2   : > { %1086 = vmatpush1.msra.mxu1 %v430_v5  ;;  %1016 = vmatprep.subr.mxu0 %v365_v6  ;;  %v464_v5 = vld [vmem:[%s1911_s8 + $0x730] sm:$0xff]  ;;  %v399_v6 = vld [vmem:[%s1911_s8 + $0x528] sm:$0xff] }
  0xb3   : > { %1087 = vmatprep.subr.mxu1 %v429_v7  ;;  %1017 = vmatpush1.msra.mxu0 %v364_v8  ;;  %v463_v7 = vld [vmem:[%s1911_s8 + $0x728] sm:$0xff]  ;;  %v786_v8 = vrot.slane %v231_v60, %v2041_v52 }
  0xb4   : > { %1088 = vmatpush1.msra.mxu1 %v428_v9  ;;  %1018 = vmatprep.subr.mxu0 %v363_v10  ;;  %v398_v9 = vld [vmem:[%s1911_s8 + $0x520] sm:$0xff]  ;;  %v503_v60 = vld [vmem:[%s1911_s8 + $0x868] sm:$0xff] }
  0xb5   : > { %1089 = vmatprep.subr.mxu1 %v427_v11  ;;  %1019 = vmatpush1.msra.mxu0 %v362_v12  ;;  %v462_v10 = vld [vmem:[%s1911_s8 + $0x720] sm:$0xff]  ;;  %v397_v11 = vld [vmem:[%s1911_s8 + $0x518] sm:$0xff] }
  0xb6   : > { %1090 = vmatpush1.msra.mxu1 %v426_v13  ;;  %1020 = vmatprep.subr.mxu0 %v425_v14  ;;  %v461_v12 = vld [vmem:[%s1911_s8 + $0x718] sm:$0xff]  ;;  %v793_v13 = vrot.slane %v779_v3, %v2041_v52  ;;  %v396_v14 = vld [vmem:[%s1911_s8 + $0x510] sm:$0xff] }
  0xb7   : > { %1091 = vmatprep.subr.mxu1 %v489_v15  ;;  %1021 = vmatpush2.msra.mxu0 %v424_v16  ;;  %v460_v15 = vld [vmem:[%s1911_s8 + $0x710] sm:$0xff]  ;;  %v395_v16 = vld [vmem:[%s1911_s8 + $0x508] sm:$0xff] }
  0xb8   : > { %1092 = vmatpush2.msra.mxu1 %v488_v17  ;;  %1022 = vmatprep.subr.mxu0 %v423_v18  ;;  %v459_v17 = vld [vmem:[%s1911_s8 + $0x708] sm:$0xff]  ;;  %v794_v18 = vcombine.high %v786_v8, %v786_v8  ;;  %v564_v3 = vld [vmem:[%s1911_s8 + $0xa50] sm:$0xff] }
  0xb9   : > { %1093 = vmatprep.subr.mxu1 %v487_v19  ;;  %1023 = vmatpush2.msra.mxu0 %v422_v20  ;;  %v394_v19 = vld [vmem:[%s1911_s8 + $0x500] sm:$0xff] }
  0xba   : > { %1094 = vmatpush2.msra.mxu1 %v486_v21  ;;  %1024 = vmatprep.subr.mxu0 %v421_v22  ;;  %v458_v20 = vld [vmem:[%s1911_s8 + $0x700] sm:$0xff]  ;;  %v795_v21 = vcombine.high %v793_v13, %v793_v13  ;;  %v521_v22 = vld [vmem:[%s1911_s8 + $0x8f8] sm:$0xff] }
  0xbb   : > { %1095 = vmatprep.subr.mxu1 %v485_v23  ;;  %1025 = vmatpush2.msra.mxu0 %v420_v24  ;;  %v585_v23 = vld [vmem:[%s1911_s8 + $0xaf8] sm:$0xff]  ;;  %v520_v24 = vld [vmem:[%s1911_s8 + $0x8f0] sm:$0xff] }
  0xbc   : > { %1096 = vmatpush2.msra.mxu1 %v484_v25  ;;  %1026 = vmatprep.subr.mxu0 %v419_v26  ;;  %v584_v25 = vld [vmem:[%s1911_s8 + $0xaf0] sm:$0xff]  ;;  %v519_v26 = vld [vmem:[%s1911_s8 + $0x8e8] sm:$0xff] }
  0xbd   : > { %1097 = vmatprep.subr.mxu1 %v483_v27  ;;  %1027 = vmatpush2.msra.mxu0 %v418_v28  ;;  %v583_v27 = vld [vmem:[%s1911_s8 + $0xae8] sm:$0xff]  ;;  %v518_v28 = vld [vmem:[%s1911_s8 + $0x8e0] sm:$0xff] }
  0xbe   : > { %1098 = vmatpush2.msra.mxu1 %v482_v29  ;;  %1028 = vmatprep.subr.mxu0 %v417_v30  ;;  %v582_v29 = vld [vmem:[%s1911_s8 + $0xae0] sm:$0xff]  ;;  %v517_v30 = vld [vmem:[%s1911_s8 + $0x8d8] sm:$0xff] }
  0xbf   : > { %1099 = vmatprep.subr.mxu1 %v481_v31  ;;  %1029 = vmatpush2.msra.mxu0 %v416_v32  ;;  %v581_v31 = vld [vmem:[%s1911_s8 + $0xad8] sm:$0xff]  ;;  %v516_v32 = vld [vmem:[%s1911_s8 + $0x8d0] sm:$0xff] }
  0xc0   : > { %1100 = vmatpush2.msra.mxu1 %v480_v33  ;;  %1030 = vmatprep.subr.mxu0 %v415_v34  ;;  %v580_v33 = vld [vmem:[%s1911_s8 + $0xad0] sm:$0xff]  ;;  %v515_v34 = vld [vmem:[%s1911_s8 + $0x8c8] sm:$0xff] }
  0xc1   : > { %1101 = vmatprep.subr.mxu1 %v479_v35  ;;  %1031 = vmatpush2.msra.mxu0 %v414_v36  ;;  %v579_v35 = vld [vmem:[%s1911_s8 + $0xac8] sm:$0xff]  ;;  %v514_v36 = vld [vmem:[%s1911_s8 + $0x8c0] sm:$0xff] }
  0xc2   : > { %1102 = vmatpush2.msra.mxu1 %v478_v37  ;;  %1032 = vmatprep.subr.mxu0 %v413_v38  ;;  %v578_v37 = vld [vmem:[%s1911_s8 + $0xac0] sm:$0xff]  ;;  %v513_v38 = vld [vmem:[%s1911_s8 + $0x8b8] sm:$0xff] }
  0xc3   : > { %1103 = vmatprep.subr.mxu1 %v477_v39  ;;  %1033 = vmatpush2.msra.mxu0 %v412_v40  ;;  %v577_v39 = vld [vmem:[%s1911_s8 + $0xab8] sm:$0xff]  ;;  %v512_v40 = vld [vmem:[%s1911_s8 + $0x8b0] sm:$0xff] }
  0xc4   : > { %1104 = vmatpush2.msra.mxu1 %v476_v42  ;;  %1034 = vmatprep.subr.mxu0 %v411_v43  ;;  %v576_v42 = vld [vmem:[%s1911_s8 + $0xab0] sm:$0xff]  ;;  %v511_v43 = vld [vmem:[%s1911_s8 + $0x8a8] sm:$0xff] }
  0xc5   : > { %1105 = vmatprep.subr.mxu1 %v475_v44  ;;  %1035 = vmatpush2.msra.mxu0 %v410_v45  ;;  %v575_v44 = vld [vmem:[%s1911_s8 + $0xaa8] sm:$0xff]  ;;  %v510_v45 = vld [vmem:[%s1911_s8 + $0x8a0] sm:$0xff] }
  0xc6   : > { %1106 = vmatpush2.msra.mxu1 %v474_v46  ;;  %1036 = vmatprep.subr.mxu0 %v409_v47  ;;  %v574_v46 = vld [vmem:[%s1911_s8 + $0xaa0] sm:$0xff]  ;;  %v509_v47 = vld [vmem:[%s1911_s8 + $0x898] sm:$0xff] }
  0xc7   : > { %1107 = vmatprep.subr.mxu1 %v473_v48  ;;  %1037 = vmatpush2.msra.mxu0 %v408_v49  ;;  %v573_v48 = vld [vmem:[%s1911_s8 + $0xa98] sm:$0xff]  ;;  %v508_v49 = vld [vmem:[%s1911_s8 + $0x890] sm:$0xff] }
  0xc8   : > { %1108 = vmatpush2.msra.mxu1 %v472_v50  ;;  %1038 = vmatprep.subr.mxu0 %v407_v51  ;;  %v572_v50 = vld [vmem:[%s1911_s8 + $0xa90] sm:$0xff]  ;;  %v507_v51 = vld [vmem:[%s1911_s8 + $0x888] sm:$0xff] }
  0xc9   : > { %1109 = vmatprep.subr.mxu1 %v471_v53  ;;  %1039 = vmatpush2.msra.mxu0 %v406_v54  ;;  %v571_v53 = vld [vmem:[%s1911_s8 + $0xa88] sm:$0xff]  ;;  %v506_v54 = vld [vmem:[%s1911_s8 + $0x880] sm:$0xff] }
  0xca   : > { %1110 = vmatpush2.msra.mxu1 %v470_v55  ;;  %1040 = vmatprep.subr.mxu0 %v405_v56  ;;  %v570_v55 = vld [vmem:[%s1911_s8 + $0xa80] sm:$0xff]  ;;  %v505_v56 = vld [vmem:[%s1911_s8 + $0x878] sm:$0xff] }
  0xcb   : > { %1111 = vmatprep.subr.mxu1 %v469_v57  ;;  %1041 = vmatpush2.msra.mxu0 %v404_v58  ;;  %v569_v57 = vld [vmem:[%s1911_s8 + $0xa78] sm:$0xff]  ;;  %v504_v58 = vld [vmem:[%s1911_s8 + $0x870] sm:$0xff] }
  0xcc   : > { %1112 = vmatpush2.msra.mxu1 %v468_v59  ;;  %1042 = vmatprep.subr.mxu0 %v403_v61  ;;  %v568_v59 = vld [vmem:[%s1911_s8 + $0xa70] sm:$0xff]  ;;  %v567_v61 = vld [vmem:[%s1911_s8 + $0xa68] sm:$0xff] }
  0xcd   : > { %1113 = vmatprep.subr.mxu1 %v467_v62  ;;  %1043 = vmatpush2.msra.mxu0 %v402_v63  ;;  %v502_v62 = vld [vmem:[%s1911_s8 + $0x860] sm:$0xff] }
  0xce   : > { %1114 = vmatpush2.msra.mxu1 %v466_v0  ;;  %1044 = vmatprep.subr.mxu0 %v401_v1  ;;  %v566_v63 = vld [vmem:[%s1911_s8 + $0xa60] sm:$0xff]  ;;  %v501_v0 = vld [vmem:[%s1911_s8 + $0x858] sm:$0xff] }
  0xcf   : > { %1115 = vmatprep.subr.mxu1 %v465_v2  ;;  %1045 = vmatpush2.msra.mxu0 %v400_v4  ;;  %v565_v1 = vld [vmem:[%s1911_s8 + $0xa58] sm:$0xff]  ;;  %v500_v2 = vld [vmem:[%s1911_s8 + $0x850] sm:$0xff]  ;;  %v499_v4 = vld [vmem:[%s1911_s8 + $0x848] sm:$0xff] }
  0xd0   : > { %1116 = vmatpush2.msra.mxu1 %v464_v5  ;;  %1046 = vmatprep.subr.mxu0 %v399_v6  ;;  %v563_v5 = vld [vmem:[%s1911_s8 + $0xa48] sm:$0xff]  ;;  %v498_v6 = vld [vmem:[%s1911_s8 + $0x840] sm:$0xff] }
  0xd1   : > { %1117 = vmatprep.subr.mxu1 %v463_v7  ;;  %1047 = vmatpush2.msra.mxu0 %v398_v9  ;;  %v562_v7 = vld [vmem:[%s1911_s8 + $0xa40] sm:$0xff]  ;;  %v561_v9 = vld [vmem:[%s1911_s8 + $0xa38] sm:$0xff] }
  0xd2   : > { %1118 = vmatpush2.msra.mxu1 %v462_v10  ;;  %1048 = vmatprep.subr.mxu0 %v397_v11  ;;  %v496_v10 = vld [vmem:[%s1911_s8 + $0x830] sm:$0xff] }
  0xd3   : > { %1119 = vmatprep.subr.mxu1 %v461_v12  ;;  %1049 = vmatpush2.msra.mxu0 %v396_v14  ;;  %v560_v11 = vld [vmem:[%s1911_s8 + $0xa30] sm:$0xff]  ;;  %v495_v12 = vld [vmem:[%s1911_s8 + $0x828] sm:$0xff]  ;;  %v494_v14 = vld [vmem:[%s1911_s8 + $0x820] sm:$0xff] }
  0xd4   : > { %1120 = vmatpush2.msra.mxu1 %v460_v15  ;;  %1050 = vmatprep.subr.mxu0 %v395_v16  ;;  %v558_v15 = vld [vmem:[%s1911_s8 + $0xa20] sm:$0xff]  ;;  %v493_v16 = vld [vmem:[%s1911_s8 + $0x818] sm:$0xff] }
  0xd5   : > { %1121 = vmatprep.subr.mxu1 %v459_v17  ;;  %1051 = vmatpush2.msra.mxu0 %v394_v19  ;;  %v557_v17 = vld [vmem:[%s1911_s8 + $0xa18] sm:$0xff]  ;;  %v556_v19 = vld [vmem:[%s1911_s8 + $0xa10] sm:$0xff] }
  0xd6   : > { %1052 = vmatprep.mubr.f32.mxu0 %v794_v18  ;;  %1122 = vmatpush2.msra.mxu1 %v458_v20  ;;  %v492_v18 = vld [vmem:[%s1911_s8 + $0x810] sm:$0xff]  ;;  %v491_v20 = vld [vmem:[%s1911_s8 + $0x808] sm:$0xff] }
  0xd7   : > { %1053 = vmatmul.mubr.f32.vlgmr.msra.gmra.mxu0 %v786_v8  ;;  %1123 = vmatprep.mubr.f32.mxu1 %v795_v21  ;;  %v497_v8 = vld [vmem:[%s1911_s8 + $0x838] sm:$0xff]  ;;  %v555_v21 = vld [vmem:[%s1911_s8 + $0xa08] sm:$0xff] }
  0xd8   : > { %1130 = vmatprep.subr.mxu0 %v521_v22  ;;  %1201 = vmatprep.subr.mxu1 %v585_v23  ;;  %v490_v22 = vld [vmem:[%s1911_s8 + $0x800] sm:$0xff] }
  0xd9   : > { %1124 = vmatmul.mubr.f32.vlgmr.msra.gmra.mxu1 %v793_v13  ;;  %1131 = vmatpush1.msra.mxu0 %v520_v24  ;;  %v559_v13 = vld [vmem:[%s1911_s8 + $0xa28] sm:$0xff]  ;;  %v554_v23 = vld [vmem:[%s1911_s8 + $0xa00] sm:$0xff]  ;;  %v553_v24 = vld [vmem:[%s1911_s8 + $0x9f8] sm:$0xff] }
  0xda   : > { %1202 = vmatpush1.msra.mxu1 %v584_v25  ;;  %1132 = vmatprep.subr.mxu0 %v519_v26  ;;  %v617_v25 = vld [vmem:[%s1911_s8 + $0xbf8] sm:$0xff]  ;;  %v552_v26 = vld [vmem:[%s1911_s8 + $0x9f0] sm:$0xff] }
  0xdb   : > { %1203 = vmatprep.subr.mxu1 %v583_v27  ;;  %1133 = vmatpush1.msra.mxu0 %v518_v28  ;;  %v616_v27 = vld [vmem:[%s1911_s8 + $0xbf0] sm:$0xff]  ;;  %v551_v28 = vld [vmem:[%s1911_s8 + $0x9e8] sm:$0xff] }
  0xdc   : > { %1204 = vmatpush1.msra.mxu1 %v582_v29  ;;  %1134 = vmatprep.subr.mxu0 %v517_v30  ;;  %v615_v29 = vld [vmem:[%s1911_s8 + $0xbe8] sm:$0xff]  ;;  %v550_v30 = vld [vmem:[%s1911_s8 + $0x9e0] sm:$0xff] }
  0xdd   : > { %1205 = vmatprep.subr.mxu1 %v581_v31  ;;  %1135 = vmatpush1.msra.mxu0 %v516_v32  ;;  %v614_v31 = vld [vmem:[%s1911_s8 + $0xbe0] sm:$0xff]  ;;  %v549_v32 = vld [vmem:[%s1911_s8 + $0x9d8] sm:$0xff] }
  0xde   : > { %1206 = vmatpush1.msra.mxu1 %v580_v33  ;;  %1136 = vmatprep.subr.mxu0 %v515_v34  ;;  %v613_v33 = vld [vmem:[%s1911_s8 + $0xbd8] sm:$0xff]  ;;  %v548_v34 = vld [vmem:[%s1911_s8 + $0x9d0] sm:$0xff] }
  0xdf   : > { %1207 = vmatprep.subr.mxu1 %v579_v35  ;;  %1137 = vmatpush1.msra.mxu0 %v514_v36  ;;  %v612_v35 = vld [vmem:[%s1911_s8 + $0xbd0] sm:$0xff]  ;;  %v547_v36 = vld [vmem:[%s1911_s8 + $0x9c8] sm:$0xff] }
  0xe0   : > { %1208 = vmatpush1.msra.mxu1 %v578_v37  ;;  %1138 = vmatprep.subr.mxu0 %v513_v38  ;;  %v611_v37 = vld [vmem:[%s1911_s8 + $0xbc8] sm:$0xff]  ;;  %v546_v38 = vld [vmem:[%s1911_s8 + $0x9c0] sm:$0xff] }
  0xe1   : > { %1209 = vmatprep.subr.mxu1 %v577_v39  ;;  %1139 = vmatpush1.msra.mxu0 %v512_v40  ;;  %v610_v39 = vld [vmem:[%s1911_s8 + $0xbc0] sm:$0xff]  ;;  %v545_v40 = vld [vmem:[%s1911_s8 + $0x9b8] sm:$0xff] }
  0xe2   : > { %1210 = vmatpush1.msra.mxu1 %v576_v42  ;;  %1140 = vmatprep.subr.mxu0 %v511_v43  ;;  %v609_v42 = vld [vmem:[%s1911_s8 + $0xbb8] sm:$0xff]  ;;  %v544_v43 = vld [vmem:[%s1911_s8 + $0x9b0] sm:$0xff] }
  0xe3   : > { %1211 = vmatprep.subr.mxu1 %v575_v44  ;;  %1141 = vmatpush1.msra.mxu0 %v510_v45  ;;  %v608_v44 = vld [vmem:[%s1911_s8 + $0xbb0] sm:$0xff]  ;;  %v543_v45 = vld [vmem:[%s1911_s8 + $0x9a8] sm:$0xff] }
  0xe4   : > { %1212 = vmatpush1.msra.mxu1 %v574_v46  ;;  %1142 = vmatprep.subr.mxu0 %v509_v47  ;;  %v607_v46 = vld [vmem:[%s1911_s8 + $0xba8] sm:$0xff]  ;;  %v542_v47 = vld [vmem:[%s1911_s8 + $0x9a0] sm:$0xff] }
  0xe5   : > { %1213 = vmatprep.subr.mxu1 %v573_v48  ;;  %1143 = vmatpush1.msra.mxu0 %v508_v49  ;;  %v606_v48 = vld [vmem:[%s1911_s8 + $0xba0] sm:$0xff]  ;;  %v541_v49 = vld [vmem:[%s1911_s8 + $0x998] sm:$0xff] }
  0xe6   : > { %1214 = vmatpush1.msra.mxu1 %v572_v50  ;;  %1144 = vmatprep.subr.mxu0 %v507_v51  ;;  %v605_v50 = vld [vmem:[%s1911_s8 + $0xb98] sm:$0xff]  ;;  %v540_v51 = vld [vmem:[%s1911_s8 + $0x990] sm:$0xff] }
  0xe7   : > { %1215 = vmatprep.subr.mxu1 %v571_v53  ;;  %1145 = vmatpush1.msra.mxu0 %v506_v54  ;;  %v604_v53 = vld [vmem:[%s1911_s8 + $0xb90] sm:$0xff]  ;;  %v539_v54 = vld [vmem:[%s1911_s8 + $0x988] sm:$0xff] }
  0xe8   : > { %1216 = vmatpush1.msra.mxu1 %v570_v55  ;;  %1146 = vmatprep.subr.mxu0 %v505_v56  ;;  %v603_v55 = vld [vmem:[%s1911_s8 + $0xb88] sm:$0xff]  ;;  %v538_v56 = vld [vmem:[%s1911_s8 + $0x980] sm:$0xff] }
  0xe9   : > { %1217 = vmatprep.subr.mxu1 %v569_v57  ;;  %1147 = vmatpush1.msra.mxu0 %v504_v58  ;;  %v602_v57 = vld [vmem:[%s1911_s8 + $0xb80] sm:$0xff]  ;;  %v537_v58 = vld [vmem:[%s1911_s8 + $0x978] sm:$0xff] }
  0xea   : > { %1218 = vmatpush1.msra.mxu1 %v568_v59  ;;  %1148 = vmatprep.subr.mxu0 %v503_v60  ;;  %v601_v59 = vld [vmem:[%s1911_s8 + $0xb78] sm:$0xff]  ;;  %v536_v60 = vld [vmem:[%s1911_s8 + $0x970] sm:$0xff] }
  0xeb   : > { %1219 = vmatprep.subr.mxu1 %v567_v61  ;;  %1149 = vmatpush1.msra.mxu0 %v502_v62  ;;  %v600_v61 = vld [vmem:[%s1911_s8 + $0xb70] sm:$0xff]  ;;  %v535_v62 = vld [vmem:[%s1911_s8 + $0x968] sm:$0xff] }
  0xec   : > { %1220 = vmatpush1.msra.mxu1 %v566_v63  ;;  %1150 = vmatprep.subr.mxu0 %v501_v0  ;;  %v599_v63 = vld [vmem:[%s1911_s8 + $0xb68] sm:$0xff]  ;;  %v534_v0 = vld [vmem:[%s1911_s8 + $0x960] sm:$0xff] }
  0xed   : > { %1221 = vmatprep.subr.mxu1 %v565_v1  ;;  %1151 = vmatpush1.msra.mxu0 %v500_v2  ;;  %v598_v1 = vld [vmem:[%s1911_s8 + $0xb60] sm:$0xff]  ;;  %v533_v2 = vld [vmem:[%s1911_s8 + $0x958] sm:$0xff] }
  0xee   : > { %1222 = vmatpush1.msra.mxu1 %v564_v3  ;;  %1152 = vmatprep.subr.mxu0 %v499_v4  ;;  %v597_v3 = vld [vmem:[%s1911_s8 + $0xb58] sm:$0xff]  ;;  %v532_v4 = vld [vmem:[%s1911_s8 + $0x950] sm:$0xff] }
  0xef   : > { %1223 = vmatprep.subr.mxu1 %v563_v5  ;;  %1153 = vmatpush1.msra.mxu0 %v498_v6  ;;  %v596_v5 = vld [vmem:[%s1911_s8 + $0xb50] sm:$0xff] }
  0xf0   : > { %1224 = vmatpush1.msra.mxu1 %v562_v7  ;;  %1154 = vmatprep.subr.mxu0 %v497_v8  ;;  %v232_v6 = vld [vmem:[%s2500_s0 + $0x10] sm:$0xff]  ;;  %v531_v7 = vld [vmem:[%s1911_s8 + $0x948] sm:$0xff] }
  0xf1   : > { %1225 = vmatprep.subr.mxu1 %v561_v9  ;;  %1155 = vmatpush1.msra.mxu0 %v496_v10  ;;  %v595_v8 = vld [vmem:[%s1911_s8 + $0xb48] sm:$0xff]  ;;  %v530_v9 = vld [vmem:[%s1911_s8 + $0x940] sm:$0xff] }
  0xf2   : > { %1226 = vmatpush1.msra.mxu1 %v560_v11  ;;  %1156 = vmatprep.subr.mxu0 %v495_v12  ;;  %v594_v10 = vld [vmem:[%s1911_s8 + $0xb40] sm:$0xff]  ;;  %v529_v11 = vld [vmem:[%s1911_s8 + $0x938] sm:$0xff] }
  0xf3   : > { %1227 = vmatprep.subr.mxu1 %v559_v13  ;;  %1157 = vmatpush1.msra.mxu0 %v494_v14  ;;  %v593_v12 = vld [vmem:[%s1911_s8 + $0xb38] sm:$0xff]  ;;  %v796_v13 = vcombine.high %v232_v6, %v232_v6  ;;  %v528_v14 = vld [vmem:[%s1911_s8 + $0x930] sm:$0xff] }
  0xf4   : > { %1228 = vmatpush1.msra.mxu1 %v558_v15  ;;  %1158 = vmatprep.subr.mxu0 %v493_v16  ;;  %v592_v15 = vld [vmem:[%s1911_s8 + $0xb30] sm:$0xff]  ;;  %v527_v16 = vld [vmem:[%s1911_s8 + $0x928] sm:$0xff] }
  0xf5   : > { %1229 = vmatprep.subr.mxu1 %v557_v17  ;;  %1159 = vmatpush1.msra.mxu0 %v492_v18  ;;  %v591_v17 = vld [vmem:[%s1911_s8 + $0xb28] sm:$0xff]  ;;  %v803_v18 = vrot.slane %v232_v6, %v2041_v52 }
  0xf6   : > { %1230 = vmatpush1.msra.mxu1 %v556_v19  ;;  %1160 = vmatprep.subr.mxu0 %v491_v20  ;;  %v526_v19 = vld [vmem:[%s1911_s8 + $0x920] sm:$0xff]  ;;  %v631_v6 = vld [vmem:[%s1911_s8 + $0xc68] sm:$0xff] }
  0xf7   : > { %1231 = vmatprep.subr.mxu1 %v555_v21  ;;  %1161 = vmatpush1.msra.mxu0 %v490_v22  ;;  %v590_v20 = vld [vmem:[%s1911_s8 + $0xb20] sm:$0xff]  ;;  %v525_v21 = vld [vmem:[%s1911_s8 + $0x918] sm:$0xff] }
  0xf8   : > { %1232 = vmatpush1.msra.mxu1 %v554_v23  ;;  %1162 = vmatprep.subr.mxu0 %v553_v24  ;;  %v589_v22 = vld [vmem:[%s1911_s8 + $0xb18] sm:$0xff]  ;;  %v810_v23 = vrot.slane %v796_v13, %v2041_v52  ;;  %v524_v24 = vld [vmem:[%s1911_s8 + $0x910] sm:$0xff] }
  0xf9   : > { %1233 = vmatprep.subr.mxu1 %v617_v25  ;;  %1163 = vmatpush2.msra.mxu0 %v552_v26  ;;  %v588_v25 = vld [vmem:[%s1911_s8 + $0xb10] sm:$0xff]  ;;  %v523_v26 = vld [vmem:[%s1911_s8 + $0x908] sm:$0xff] }
  0xfa   : > { %1234 = vmatpush2.msra.mxu1 %v616_v27  ;;  %1164 = vmatprep.subr.mxu0 %v551_v28  ;;  %v587_v27 = vld [vmem:[%s1911_s8 + $0xb08] sm:$0xff]  ;;  %v811_v28 = vcombine.high %v803_v18, %v803_v18  ;;  %v692_v13 = vld [vmem:[%s1911_s8 + $0xe50] sm:$0xff] }
  0xfb   : > { %1235 = vmatprep.subr.mxu1 %v615_v29  ;;  %1165 = vmatpush2.msra.mxu0 %v550_v30  ;;  %v522_v29 = vld [vmem:[%s1911_s8 + $0x900] sm:$0xff] }
  0xfc   : > { %1236 = vmatpush2.msra.mxu1 %v614_v31  ;;  %1166 = vmatprep.subr.mxu0 %v549_v32  ;;  %v586_v30 = vld [vmem:[%s1911_s8 + $0xb00] sm:$0xff]  ;;  %v812_v31 = vcombine.high %v810_v23, %v810_v23  ;;  %v649_v32 = vld [vmem:[%s1911_s8 + $0xcf8] sm:$0xff] }
  0xfd   : > { %1237 = vmatprep.subr.mxu1 %v613_v33  ;;  %1167 = vmatpush2.msra.mxu0 %v548_v34  ;;  %v713_v33 = vld [vmem:[%s1911_s8 + $0xef8] sm:$0xff]  ;;  %v648_v34 = vld [vmem:[%s1911_s8 + $0xcf0] sm:$0xff] }
  0xfe   : > { %1238 = vmatpush2.msra.mxu1 %v612_v35  ;;  %1168 = vmatprep.subr.mxu0 %v547_v36  ;;  %v712_v35 = vld [vmem:[%s1911_s8 + $0xef0] sm:$0xff]  ;;  %v647_v36 = vld [vmem:[%s1911_s8 + $0xce8] sm:$0xff] }
  0xff   : > { %1239 = vmatprep.subr.mxu1 %v611_v37  ;;  %1169 = vmatpush2.msra.mxu0 %v546_v38  ;;  %v711_v37 = vld [vmem:[%s1911_s8 + $0xee8] sm:$0xff]  ;;  %v646_v38 = vld [vmem:[%s1911_s8 + $0xce0] sm:$0xff] }
 0x100   : > { %1240 = vmatpush2.msra.mxu1 %v610_v39  ;;  %1170 = vmatprep.subr.mxu0 %v545_v40  ;;  %v710_v39 = vld [vmem:[%s1911_s8 + $0xee0] sm:$0xff]  ;;  %v645_v40 = vld [vmem:[%s1911_s8 + $0xcd8] sm:$0xff] }
 0x101   : > { %1241 = vmatprep.subr.mxu1 %v609_v42  ;;  %1171 = vmatpush2.msra.mxu0 %v544_v43  ;;  %v709_v42 = vld [vmem:[%s1911_s8 + $0xed8] sm:$0xff]  ;;  %v644_v43 = vld [vmem:[%s1911_s8 + $0xcd0] sm:$0xff] }
 0x102   : > { %1242 = vmatpush2.msra.mxu1 %v608_v44  ;;  %1172 = vmatprep.subr.mxu0 %v543_v45  ;;  %v708_v44 = vld [vmem:[%s1911_s8 + $0xed0] sm:$0xff]  ;;  %v643_v45 = vld [vmem:[%s1911_s8 + $0xcc8] sm:$0xff] }
 0x103   : > { %1243 = vmatprep.subr.mxu1 %v607_v46  ;;  %1173 = vmatpush2.msra.mxu0 %v542_v47  ;;  %v707_v46 = vld [vmem:[%s1911_s8 + $0xec8] sm:$0xff]  ;;  %v642_v47 = vld [vmem:[%s1911_s8 + $0xcc0] sm:$0xff] }
 0x104   : > { %1244 = vmatpush2.msra.mxu1 %v606_v48  ;;  %1174 = vmatprep.subr.mxu0 %v541_v49  ;;  %v706_v48 = vld [vmem:[%s1911_s8 + $0xec0] sm:$0xff]  ;;  %v641_v49 = vld [vmem:[%s1911_s8 + $0xcb8] sm:$0xff] }
 0x105   : > { %1245 = vmatprep.subr.mxu1 %v605_v50  ;;  %1175 = vmatpush2.msra.mxu0 %v540_v51  ;;  %v705_v50 = vld [vmem:[%s1911_s8 + $0xeb8] sm:$0xff]  ;;  %v640_v51 = vld [vmem:[%s1911_s8 + $0xcb0] sm:$0xff] }
 0x106   : > { %1246 = vmatpush2.msra.mxu1 %v604_v53  ;;  %1176 = vmatprep.subr.mxu0 %v539_v54  ;;  %v704_v53 = vld [vmem:[%s1911_s8 + $0xeb0] sm:$0xff]  ;;  %v639_v54 = vld [vmem:[%s1911_s8 + $0xca8] sm:$0xff] }
 0x107   : > { %1247 = vmatprep.subr.mxu1 %v603_v55  ;;  %1177 = vmatpush2.msra.mxu0 %v538_v56  ;;  %v703_v55 = vld [vmem:[%s1911_s8 + $0xea8] sm:$0xff]  ;;  %v638_v56 = vld [vmem:[%s1911_s8 + $0xca0] sm:$0xff] }
 0x108   : > { %1248 = vmatpush2.msra.mxu1 %v602_v57  ;;  %1178 = vmatprep.subr.mxu0 %v537_v58  ;;  %v702_v57 = vld [vmem:[%s1911_s8 + $0xea0] sm:$0xff]  ;;  %v637_v58 = vld [vmem:[%s1911_s8 + $0xc98] sm:$0xff] }
 0x109   : > { %1249 = vmatprep.subr.mxu1 %v601_v59  ;;  %1179 = vmatpush2.msra.mxu0 %v536_v60  ;;  %v701_v59 = vld [vmem:[%s1911_s8 + $0xe98] sm:$0xff]  ;;  %v636_v60 = vld [vmem:[%s1911_s8 + $0xc90] sm:$0xff] }
 0x10a   : > { %1250 = vmatpush2.msra.mxu1 %v600_v61  ;;  %1180 = vmatprep.subr.mxu0 %v535_v62  ;;  %v700_v61 = vld [vmem:[%s1911_s8 + $0xe90] sm:$0xff]  ;;  %v635_v62 = vld [vmem:[%s1911_s8 + $0xc88] sm:$0xff] }
 0x10b   : > { %1251 = vmatprep.subr.mxu1 %v599_v63  ;;  %1181 = vmatpush2.msra.mxu0 %v534_v0  ;;  %v699_v63 = vld [vmem:[%s1911_s8 + $0xe88] sm:$0xff]  ;;  %v634_v0 = vld [vmem:[%s1911_s8 + $0xc80] sm:$0xff] }
 0x10c   : > { %1252 = vmatpush2.msra.mxu1 %v598_v1  ;;  %1182 = vmatprep.subr.mxu0 %v533_v2  ;;  %v698_v1 = vld [vmem:[%s1911_s8 + $0xe80] sm:$0xff]  ;;  %v633_v2 = vld [vmem:[%s1911_s8 + $0xc78] sm:$0xff] }
 0x10d   : > { %1253 = vmatprep.subr.mxu1 %v597_v3  ;;  %1183 = vmatpush2.msra.mxu0 %v532_v4  ;;  %v697_v3 = vld [vmem:[%s1911_s8 + $0xe78] sm:$0xff]  ;;  %v632_v4 = vld [vmem:[%s1911_s8 + $0xc70] sm:$0xff] }
 0x10e   : > { %1254 = vmatpush2.msra.mxu1 %v596_v5  ;;  %1184 = vmatprep.subr.mxu0 %v531_v7  ;;  %v696_v5 = vld [vmem:[%s1911_s8 + $0xe70] sm:$0xff]  ;;  %v695_v7 = vld [vmem:[%s1911_s8 + $0xe68] sm:$0xff] }
 0x10f   : > { %1255 = vmatprep.subr.mxu1 %v595_v8  ;;  %1185 = vmatpush2.msra.mxu0 %v530_v9  ;;  %v630_v8 = vld [vmem:[%s1911_s8 + $0xc60] sm:$0xff] }
 0x110   : > { %1256 = vmatpush2.msra.mxu1 %v594_v10  ;;  %1186 = vmatprep.subr.mxu0 %v529_v11  ;;  %v694_v9 = vld [vmem:[%s1911_s8 + $0xe60] sm:$0xff]  ;;  %v629_v10 = vld [vmem:[%s1911_s8 + $0xc58] sm:$0xff] }
 0x111   : > { %1257 = vmatprep.subr.mxu1 %v593_v12  ;;  %1187 = vmatpush2.msra.mxu0 %v528_v14  ;;  %v693_v11 = vld [vmem:[%s1911_s8 + $0xe58] sm:$0xff]  ;;  %v628_v12 = vld [vmem:[%s1911_s8 + $0xc50] sm:$0xff]  ;;  %v627_v14 = vld [vmem:[%s1911_s8 + $0xc48] sm:$0xff] }
 0x112   : > { %1258 = vmatpush2.msra.mxu1 %v592_v15  ;;  %1188 = vmatprep.subr.mxu0 %v527_v16  ;;  %v691_v15 = vld [vmem:[%s1911_s8 + $0xe48] sm:$0xff]  ;;  %v626_v16 = vld [vmem:[%s1911_s8 + $0xc40] sm:$0xff] }
 0x113   : > { %1259 = vmatprep.subr.mxu1 %v591_v17  ;;  %1189 = vmatpush2.msra.mxu0 %v526_v19  ;;  %v690_v17 = vld [vmem:[%s1911_s8 + $0xe40] sm:$0xff]  ;;  %v689_v19 = vld [vmem:[%s1911_s8 + $0xe38] sm:$0xff] }
 0x114   : > { %1260 = vmatpush2.msra.mxu1 %v590_v20  ;;  %1190 = vmatprep.subr.mxu0 %v525_v21  ;;  %v624_v20 = vld [vmem:[%s1911_s8 + $0xc30] sm:$0xff] }
 0x115   : > { %1261 = vmatprep.subr.mxu1 %v589_v22  ;;  %1191 = vmatpush2.msra.mxu0 %v524_v24  ;;  %v688_v21 = vld [vmem:[%s1911_s8 + $0xe30] sm:$0xff]  ;;  %v623_v22 = vld [vmem:[%s1911_s8 + $0xc28] sm:$0xff]  ;;  %v622_v24 = vld [vmem:[%s1911_s8 + $0xc20] sm:$0xff] }
 0x116   : > { %1262 = vmatpush2.msra.mxu1 %v588_v25  ;;  %1192 = vmatprep.subr.mxu0 %v523_v26  ;;  %v686_v25 = vld [vmem:[%s1911_s8 + $0xe20] sm:$0xff]  ;;  %v621_v26 = vld [vmem:[%s1911_s8 + $0xc18] sm:$0xff] }
 0x117   : > { %1263 = vmatprep.subr.mxu1 %v587_v27  ;;  %1193 = vmatpush2.msra.mxu0 %v522_v29  ;;  %v685_v27 = vld [vmem:[%s1911_s8 + $0xe18] sm:$0xff]  ;;  %v684_v29 = vld [vmem:[%s1911_s8 + $0xe10] sm:$0xff] }
 0x118   : > { %1194 = vmatprep.mubr.f32.mxu0 %v811_v28  ;;  %1264 = vmatpush2.msra.mxu1 %v586_v30  ;;  %v620_v28 = vld [vmem:[%s1911_s8 + $0xc10] sm:$0xff]  ;;  %v619_v30 = vld [vmem:[%s1911_s8 + $0xc08] sm:$0xff] }
 0x119   : > { %1195 = vmatmul.mubr.f32.vlgmr.msra.gmra.mxu0 %v803_v18  ;;  %1265 = vmatprep.mubr.f32.mxu1 %v812_v31  ;;  %v625_v18 = vld [vmem:[%s1911_s8 + $0xc38] sm:$0xff]  ;;  %v683_v31 = vld [vmem:[%s1911_s8 + $0xe08] sm:$0xff] }
 0x11a   : > { %1272 = vmatprep.subr.mxu0 %v649_v32  ;;  %1343 = vmatprep.subr.mxu1 %v713_v33  ;;  %v618_v32 = vld [vmem:[%s1911_s8 + $0xc00] sm:$0xff] }
 0x11b   : > { %1266 = vmatmul.mubr.f32.vlgmr.msra.gmra.mxu1 %v810_v23  ;;  %1273 = vmatpush1.msra.mxu0 %v648_v34  ;;  %v687_v23 = vld [vmem:[%s1911_s8 + $0xe28] sm:$0xff]  ;;  %v682_v33 = vld [vmem:[%s1911_s8 + $0xe00] sm:$0xff]  ;;  %v681_v34 = vld [vmem:[%s1911_s8 + $0xdf8] sm:$0xff] }
 0x11c   : > { %1344 = vmatpush1.msra.mxu1 %v712_v35  ;;  %1274 = vmatprep.subr.mxu0 %v647_v36  ;;  %v745_v35 = vld [vmem:[%s1911_s8 + $0xff8] sm:$0xff]  ;;  %v680_v36 = vld [vmem:[%s1911_s8 + $0xdf0] sm:$0xff] }
 0x11d   : > { %1345 = vmatprep.subr.mxu1 %v711_v37  ;;  %1275 = vmatpush1.msra.mxu0 %v646_v38  ;;  %v744_v37 = vld [vmem:[%s1911_s8 + $0xff0] sm:$0xff]  ;;  %v679_v38 = vld [vmem:[%s1911_s8 + $0xde8] sm:$0xff] }
 0x11e   : > { %1346 = vmatpush1.msra.mxu1 %v710_v39  ;;  %1276 = vmatprep.subr.mxu0 %v645_v40  ;;  %v743_v39 = vld [vmem:[%s1911_s8 + $0xfe8] sm:$0xff]  ;;  %v678_v40 = vld [vmem:[%s1911_s8 + $0xde0] sm:$0xff] }
 0x11f   : > { %1347 = vmatprep.subr.mxu1 %v709_v42  ;;  %1277 = vmatpush1.msra.mxu0 %v644_v43  ;;  %v742_v42 = vld [vmem:[%s1911_s8 + $0xfe0] sm:$0xff]  ;;  %v677_v43 = vld [vmem:[%s1911_s8 + $0xdd8] sm:$0xff] }
 0x120   : > { %1348 = vmatpush1.msra.mxu1 %v708_v44  ;;  %1278 = vmatprep.subr.mxu0 %v643_v45  ;;  %v741_v44 = vld [vmem:[%s1911_s8 + $0xfd8] sm:$0xff]  ;;  %v676_v45 = vld [vmem:[%s1911_s8 + $0xdd0] sm:$0xff] }
 0x121   : > { %1349 = vmatprep.subr.mxu1 %v707_v46  ;;  %1279 = vmatpush1.msra.mxu0 %v642_v47  ;;  %v740_v46 = vld [vmem:[%s1911_s8 + $0xfd0] sm:$0xff]  ;;  %v675_v47 = vld [vmem:[%s1911_s8 + $0xdc8] sm:$0xff] }
 0x122   : > { %1350 = vmatpush1.msra.mxu1 %v706_v48  ;;  %1280 = vmatprep.subr.mxu0 %v641_v49  ;;  %v739_v48 = vld [vmem:[%s1911_s8 + $0xfc8] sm:$0xff]  ;;  %v674_v49 = vld [vmem:[%s1911_s8 + $0xdc0] sm:$0xff] }
 0x123   : > { %1351 = vmatprep.subr.mxu1 %v705_v50  ;;  %1281 = vmatpush1.msra.mxu0 %v640_v51  ;;  %v738_v50 = vld [vmem:[%s1911_s8 + $0xfc0] sm:$0xff]  ;;  %v673_v51 = vld [vmem:[%s1911_s8 + $0xdb8] sm:$0xff] }
 0x124   : > { %1352 = vmatpush1.msra.mxu1 %v704_v53  ;;  %1282 = vmatprep.subr.mxu0 %v639_v54  ;;  %v737_v53 = vld [vmem:[%s1911_s8 + $0xfb8] sm:$0xff]  ;;  %v672_v54 = vld [vmem:[%s1911_s8 + $0xdb0] sm:$0xff] }
 0x125   : > { %1353 = vmatprep.subr.mxu1 %v703_v55  ;;  %1283 = vmatpush1.msra.mxu0 %v638_v56  ;;  %v736_v55 = vld [vmem:[%s1911_s8 + $0xfb0] sm:$0xff]  ;;  %v671_v56 = vld [vmem:[%s1911_s8 + $0xda8] sm:$0xff] }
 0x126   : > { %1354 = vmatpush1.msra.mxu1 %v702_v57  ;;  %1284 = vmatprep.subr.mxu0 %v637_v58  ;;  %v735_v57 = vld [vmem:[%s1911_s8 + $0xfa8] sm:$0xff]  ;;  %v670_v58 = vld [vmem:[%s1911_s8 + $0xda0] sm:$0xff] }
 0x127   : > { %1355 = vmatprep.subr.mxu1 %v701_v59  ;;  %1285 = vmatpush1.msra.mxu0 %v636_v60  ;;  %v734_v59 = vld [vmem:[%s1911_s8 + $0xfa0] sm:$0xff]  ;;  %v669_v60 = vld [vmem:[%s1911_s8 + $0xd98] sm:$0xff] }
 0x128   : > { %1356 = vmatpush1.msra.mxu1 %v700_v61  ;;  %1286 = vmatprep.subr.mxu0 %v635_v62  ;;  %v733_v61 = vld [vmem:[%s1911_s8 + $0xf98] sm:$0xff]  ;;  %v668_v62 = vld [vmem:[%s1911_s8 + $0xd90] sm:$0xff] }
 0x129   : > { %1357 = vmatprep.subr.mxu1 %v699_v63  ;;  %1287 = vmatpush1.msra.mxu0 %v634_v0  ;;  %v732_v63 = vld [vmem:[%s1911_s8 + $0xf90] sm:$0xff]  ;;  %v667_v0 = vld [vmem:[%s1911_s8 + $0xd88] sm:$0xff] }
 0x12a   : > { %1358 = vmatpush1.msra.mxu1 %v698_v1  ;;  %1288 = vmatprep.subr.mxu0 %v633_v2  ;;  %v731_v1 = vld [vmem:[%s1911_s8 + $0xf88] sm:$0xff]  ;;  %v666_v2 = vld [vmem:[%s1911_s8 + $0xd80] sm:$0xff] }
 0x12b   : > { %1359 = vmatprep.subr.mxu1 %v697_v3  ;;  %1289 = vmatpush1.msra.mxu0 %v632_v4  ;;  %v730_v3 = vld [vmem:[%s1911_s8 + $0xf80] sm:$0xff]  ;;  %v665_v4 = vld [vmem:[%s1911_s8 + $0xd78] sm:$0xff] }
 0x12c   : > { %1360 = vmatpush1.msra.mxu1 %v696_v5  ;;  %1290 = vmatprep.subr.mxu0 %v631_v6  ;;  %v729_v5 = vld [vmem:[%s1911_s8 + $0xf78] sm:$0xff]  ;;  %v664_v6 = vld [vmem:[%s1911_s8 + $0xd70] sm:$0xff] }
 0x12d   : > { %1361 = vmatprep.subr.mxu1 %v695_v7  ;;  %1291 = vmatpush1.msra.mxu0 %v630_v8  ;;  %v728_v7 = vld [vmem:[%s1911_s8 + $0xf70] sm:$0xff]  ;;  %v663_v8 = vld [vmem:[%s1911_s8 + $0xd68] sm:$0xff] }
 0x12e   : > { %1362 = vmatpush1.msra.mxu1 %v694_v9  ;;  %1292 = vmatprep.subr.mxu0 %v629_v10  ;;  %v727_v9 = vld [vmem:[%s1911_s8 + $0xf68] sm:$0xff]  ;;  %v662_v10 = vld [vmem:[%s1911_s8 + $0xd60] sm:$0xff] }
 0x12f   : > { %1363 = vmatprep.subr.mxu1 %v693_v11  ;;  %1293 = vmatpush1.msra.mxu0 %v628_v12  ;;  %v726_v11 = vld [vmem:[%s1911_s8 + $0xf60] sm:$0xff]  ;;  %v661_v12 = vld [vmem:[%s1911_s8 + $0xd58] sm:$0xff] }
 0x130   : > { %1364 = vmatpush1.msra.mxu1 %v692_v13  ;;  %1294 = vmatprep.subr.mxu0 %v627_v14  ;;  %v725_v13 = vld [vmem:[%s1911_s8 + $0xf58] sm:$0xff] }
 0x131   : > { %1365 = vmatprep.subr.mxu1 %v691_v15  ;;  %1295 = vmatpush1.msra.mxu0 %v626_v16  ;;  %v233_v14 = vld [vmem:[%s2500_s0 + $0x18] sm:$0xff]  ;;  %v660_v15 = vld [vmem:[%s1911_s8 + $0xd50] sm:$0xff] }
 0x132   : > { %1366 = vmatpush1.msra.mxu1 %v690_v17  ;;  %1296 = vmatprep.subr.mxu0 %v625_v18  ;;  %v724_v16 = vld [vmem:[%s1911_s8 + $0xf50] sm:$0xff]  ;;  %v659_v17 = vld [vmem:[%s1911_s8 + $0xd48] sm:$0xff] }
 0x133   : > { %1367 = vmatprep.subr.mxu1 %v689_v19  ;;  %1297 = vmatpush1.msra.mxu0 %v624_v20  ;;  %v723_v18 = vld [vmem:[%s1911_s8 + $0xf48] sm:$0xff]  ;;  %v658_v19 = vld [vmem:[%s1911_s8 + $0xd40] sm:$0xff] }
 0x134   : > { %1368 = vmatpush1.msra.mxu1 %v688_v21  ;;  %1298 = vmatprep.subr.mxu0 %v623_v22  ;;  %v722_v20 = vld [vmem:[%s1911_s8 + $0xf40] sm:$0xff]  ;;  %v813_v21 = vcombine.high %v233_v14, %v233_v14  ;;  %v657_v22 = vld [vmem:[%s1911_s8 + $0xd38] sm:$0xff] }
 0x135   : > { %1369 = vmatprep.subr.mxu1 %v687_v23  ;;  %1299 = vmatpush1.msra.mxu0 %v622_v24  ;;  %v721_v23 = vld [vmem:[%s1911_s8 + $0xf38] sm:$0xff]  ;;  %v656_v24 = vld [vmem:[%s1911_s8 + $0xd30] sm:$0xff] }
 0x136   : > { %1370 = vmatpush1.msra.mxu1 %v686_v25  ;;  %1300 = vmatprep.subr.mxu0 %v621_v26  ;;  %v720_v25 = vld [vmem:[%s1911_s8 + $0xf30] sm:$0xff]  ;;  %v655_v26 = vld [vmem:[%s1911_s8 + $0xd28] sm:$0xff] }
 0x137   : > { %1371 = vmatprep.subr.mxu1 %v685_v27  ;;  %1301 = vmatpush1.msra.mxu0 %v620_v28  ;;  %v719_v27 = vld [vmem:[%s1911_s8 + $0xf28] sm:$0xff]  ;;  %v820_v28 = vrot.slane %v233_v14, %v2041_v52 }
 0x138   : > { %1372 = vmatpush1.msra.mxu1 %v684_v29  ;;  %1302 = vmatprep.subr.mxu0 %v619_v30  ;;  %v654_v29 = vld [vmem:[%s1911_s8 + $0xd20] sm:$0xff] }
 0x139   : > { %1373 = vmatprep.subr.mxu1 %v683_v31  ;;  %1303 = vmatpush1.msra.mxu0 %v618_v32  ;;  %v718_v30 = vld [vmem:[%s1911_s8 + $0xf20] sm:$0xff]  ;;  %v827_v31 = vrot.slane %v813_v21, %v2041_v52  ;;  %v653_v32 = vld [vmem:[%s1911_s8 + $0xd18] sm:$0xff] }
 0x13a   : > { %1374 = vmatpush1.msra.mxu1 %v682_v33  ;;  %1304 = vmatprep.subr.mxu0 %v681_v34  ;;  %v717_v33 = vld [vmem:[%s1911_s8 + $0xf18] sm:$0xff]  ;;  %v652_v34 = vld [vmem:[%s1911_s8 + $0xd10] sm:$0xff] }
 0x13b   : > { %1375 = vmatprep.subr.mxu1 %v745_v35  ;;  %1305 = vmatpush2.msra.mxu0 %v680_v36  ;;  %v716_v35 = vld [vmem:[%s1911_s8 + $0xf10] sm:$0xff]  ;;  %v651_v36 = vld [vmem:[%s1911_s8 + $0xd08] sm:$0xff]  ;;  %v829_v52 = vcombine.high %v827_v31, %v827_v31 }
 0x13c   : > { %1376 = vmatpush2.msra.mxu1 %v744_v37  ;;  %1306 = vmatprep.subr.mxu0 %v679_v38  ;;  %v715_v37 = vld [vmem:[%s1911_s8 + $0xf08] sm:$0xff]  ;;  %v828_v38 = vcombine.high %v820_v28, %v820_v28 }
 0x13d   : > { %1377 = vmatprep.subr.mxu1 %v743_v39  ;;  %1307 = vmatpush2.msra.mxu0 %v678_v40  ;;  %v650_v39 = vld [vmem:[%s1911_s8 + $0xd00] sm:$0xff] }
 0x13e   : > { %1378 = vmatpush2.msra.mxu1 %v742_v42  ;;  %1308 = vmatprep.subr.mxu0 %v677_v43  ;;  %v714_v40 = vld [vmem:[%s1911_s8 + $0xf00] sm:$0xff]  ;;  %v750_v42 = vsub.s32 0, %v2027_v41 }
 0x13f   : > { %1379 = vmatprep.subr.mxu1 %v741_v44  ;;  %1309 = vmatpush2.msra.mxu0 %v676_v45  ;;  %v746_v43 = vld [vmem:[%s1919_s22] sm:$0x3]  ;;  %v754_v44 = vsub.s32 1, %v2027_v41  ;;  %s1671_s22 = scalar_lea.vmem %s1442_s27, 64 }
 0x140   : > { %1380 = vmatpush2.msra.mxu1 %v740_v46  ;;  %1310 = vmatprep.subr.mxu0 %v675_v47  ;;  %v751_v46 = vrot.slane %v746_v43, %v750_v42  ;;  %p1672_p6 = scmp.ne.s32.totalorder %s1442_s27, %s1671_s22  ;;  %p1679_p0 = scmp.lt.s32.totalorder %s1677_s16, %s1671_s22 }
 0x141   : > { %1381 = vmatprep.subr.mxu1 %v739_v48  ;;  %1311 = vmatpush2.msra.mxu0 %v674_v49  ;;  %v755_v47 = vrot.slane %v746_v43, %v754_v44 }
 0x142   : > { %1382 = vmatpush2.msra.mxu1 %v738_v50  ;;  %1312 = vmatprep.subr.mxu0 %v673_v51  ;;  %p1673_p11 = pnand %p1672_p6, %p2515_p12  ;;  %p1680_p2 = por %p1679_p0, %p1678_p9 }
 0x143   : > { %1383 = vmatprep.subr.mxu1 %v737_v53  ;;  %1313 = vmatpush2.msra.mxu0 %v672_v54 }
 0x144   : > { %1384 = vmatpush2.msra.mxu1 %v736_v55  ;;  %1314 = vmatprep.subr.mxu0 %v671_v56  ;;  %p1674_p8 = pneg %p1673_p11 }
 0x145   : > { %1385 = vmatprep.subr.mxu1 %v735_v57  ;;  %1315 = vmatpush2.msra.mxu0 %v670_v58 }
 0x146   : > { %1386 = vmatpush2.msra.mxu1 %v734_v59  ;;  %1316 = vmatprep.subr.mxu0 %v669_v60  ;;  %p1681_p4 = pnand %p1680_p2, %p1674_p8 }
 0x147   : > { %1387 = vmatprep.subr.mxu1 %v733_v61  ;;  %1317 = vmatpush2.msra.mxu0 %v668_v62 }
 0x148   : > { %1388 = vmatpush2.msra.mxu1 %v732_v63  ;;  %1318 = vmatprep.subr.mxu0 %v667_v0 }
 0x149   : > { %1389 = vmatprep.subr.mxu1 %v731_v1  ;;  %1319 = vmatpush2.msra.mxu0 %v666_v2 }
 0x14a   : > { %1390 = vmatpush2.msra.mxu1 %v730_v3  ;;  %1320 = vmatprep.subr.mxu0 %v665_v4 }
 0x14b   : > { %1391 = vmatprep.subr.mxu1 %v729_v5  ;;  %1321 = vmatpush2.msra.mxu0 %v664_v6 }
 0x14c   : > { %1392 = vmatpush2.msra.mxu1 %v728_v7  ;;  %1322 = vmatprep.subr.mxu0 %v663_v8 }
 0x14d   : > { %1393 = vmatprep.subr.mxu1 %v727_v9  ;;  %1323 = vmatpush2.msra.mxu0 %v662_v10 }
 0x14e   : > { %1394 = vmatpush2.msra.mxu1 %v726_v11  ;;  %1324 = vmatprep.subr.mxu0 %v661_v12 }
 0x14f   : > { %1395 = vmatprep.subr.mxu1 %v725_v13  ;;  %1325 = vmatpush2.msra.mxu0 %v660_v15 }
 0x150   : > { %1396 = vmatpush2.msra.mxu1 %v724_v16  ;;  %1326 = vmatprep.subr.mxu0 %v659_v17 }
 0x151   : > { %1397 = vmatprep.subr.mxu1 %v723_v18  ;;  %1327 = vmatpush2.msra.mxu0 %v658_v19 }
 0x152   : > { %1398 = vmatpush2.msra.mxu1 %v722_v20  ;;  %1328 = vmatprep.subr.mxu0 %v657_v22 }
 0x153   : > { %1399 = vmatprep.subr.mxu1 %v721_v23  ;;  %1329 = vmatpush2.msra.mxu0 %v656_v24 }
 0x154   : > { %1400 = vmatpush2.msra.mxu1 %v720_v25  ;;  %1330 = vmatprep.subr.mxu0 %v655_v26 }
 0x155   : > { %1401 = vmatprep.subr.mxu1 %v719_v27  ;;  %1331 = vmatpush2.msra.mxu0 %v654_v29  ;;  %v912_v45 = vpop.f32.mrf.mxu0 }
 0x156   : > { %1402 = vmatpush2.msra.mxu1 %v718_v30  ;;  %1332 = vmatprep.subr.mxu0 %v653_v32  ;;  %v913_v50 = vadd.f32 %v912_v45, %v751_v46 }
 0x157   : > { %1403 = vmatprep.subr.mxu1 %v717_v33  ;;  %1333 = vmatpush2.msra.mxu0 %v652_v34  ;;  %v983_v48 = vpop.f32.mrf.mxu1  ;;  %v914_v49 = vpop.f32.mrf.mxu0 }
 0x158   : > { %1404 = vmatpush2.msra.mxu1 %v716_v35  ;;  %1334 = vmatprep.subr.mxu0 %v651_v36  ;;  %v915_v53 = vadd.f32 %v914_v49, %v755_v47  ;;  %v984_v55 = vadd.f32 %v983_v48, %v913_v50 }
 0x159   : > { %1405 = vmatprep.subr.mxu1 %v715_v37  ;;  %1335 = vmatpush2.msra.mxu0 %v650_v39  ;;  %v985_v54 = vpop.f32.mrf.mxu1 }
 0x15a   : > { %1336 = vmatprep.mubr.f32.mxu0 %v828_v38  ;;  %1406 = vmatpush2.msra.mxu1 %v714_v40  ;;  %v986_v58 = vadd.f32 %v985_v54, %v915_v53 }
 0x15b   : > { %1407 = vmatprep.mubr.f32.mxu1 %v829_v52  ;;  %1337 = vmatmul.mubr.f32.vlgmr.msra.gmra.mxu0 %v820_v28 }
 0x15c   : > { %1408 = vmatmul.mubr.f32.vlgmr.msra.gmra.mxu1 %v827_v31 }
 0x197   : > { %v1054_v51 = vpop.f32.mrf.mxu0 }
 0x198   : > { %v1055_v59 = vadd.f32 %v1054_v51, %v984_v55 }
 0x199   : > { %v1125_v56 = vpop.f32.mrf.mxu1  ;;  %v1056_v57 = vpop.f32.mrf.mxu0 }
 0x19a   : > { %v1057_v61 = vadd.f32 %v1056_v57, %v986_v58  ;;  %v1126_v63 = vadd.f32 %v1125_v56, %v1055_v59 }
 0x19b   : > { %v1127_v62 = vpop.f32.mrf.mxu1 }
 0x19c   : > { %v1128_v1 = vadd.f32 %v1127_v62, %v1057_v61 }
 0x1d9   : > { %v1196_v60 = vpop.f32.mrf.mxu0 }
 0x1da   : > { %v1197_v2 = vadd.f32 %v1196_v60, %v1126_v63 }
 0x1db   : > { %v1267_v41 = vpop.f32.mrf.mxu1  ;;  %v1198_v0 = vpop.f32.mrf.mxu0 }
 0x1dc   : > { %v1199_v3 = vadd.f32 %v1198_v0, %v1128_v1  ;;  %v1268_v5 = vadd.f32 %v1267_v41, %v1197_v2 }
 0x1dd   : > { %v1269_v4 = vpop.f32.mrf.mxu1 }
 0x1de   : > { %v1270_v8 = vadd.f32 %v1269_v4, %v1199_v3 }
 0x21b   : > { %v1338_v6 = vpop.f32.mrf.mxu0 }
 0x21c   : > { %v1409_v7 = vpop.f32.mrf.mxu1  ;;  %v1339_v9 = vadd.f32 %v1338_v6, %v1268_v5 }
 0x21d   : > { %v1340_v10 = vpop.f32.mrf.mxu0 }
 0x21e   : > { %v1341_v11 = vadd.f32 %v1340_v10, %v1270_v8  ;;  %v1411_v12 = vpop.f32.mrf.mxu1  ;;  %v1410_v13 = vadd.f32 %v1409_v7, %v1339_v9 }
 0x220   : > { %v1412_v14 = vadd.f32 %v1411_v12, %v1341_v11 }
 0x222   : > { %v1416_v15 = vcombine.low %v1410_v13, %v1412_v14 }
 0x224   : > { %1547 = vst.sshfl [vmem:[%s226_s19] sm:$0x33 pattern:$0x76325410] %v1416_v15 }
 0x225   : > { %1684 = shalt.err (!%p1681_p4)
}
 0x226   : > { %s1685_s4 = scalar_lea.hbm %s1439_s7, 64  ;;  %s1689_s30 = scalar_lea.hbm %s2503_s3, 256 }
 0x227   : > { %p1686_p3 = scmp.ne.s32.totalorder %s1439_s7, %s1685_s4  ;;  %p1690_p5 = scmp.lt.s32.totalorder %s1439_s7, %s2503_s3 }
 0x228   : > { %p1691_p7 = scmp.lt.s32.totalorder %s1689_s30, %s1685_s4 }
 0x229   : > { %p1687_p10 = pnand %p1686_p3, %p2515_p12 }
 0x22a   : > { %p1692_p1 = por %p1691_p7, %p1690_p5 }
 0x22b   : > { %p1688_p13 = pneg %p1687_p10 }
 0x22d   : > { %p1693_p6 = pnand %p1692_p1, %p1688_p13 }
 0x22f   : > { %1696 = shalt.err (!%p1693_p6)
}
 0x230   : > { %1560 = dma.vmem_to_hbm [thread:$0]  (%p2515_p12), %s1442_s27, 64, %s1439_s7, %s1427_s17  }
 0x231 PF: > { %p1574_p11 = scmp.ge.s32.totalorder %s1739_s15, 2  ;;  %s1453_s10 = sand.u32 1, %s1727_s12  }
 0x232   : > { %p2516_p8 = scmp.ne.s32.totalorder %s2509_s25, 0  ;;  %s1454_s26 = scalar_lea.sflag [#allocation4], %s1453_s10 }
 0x234   : > { %p1570_p9 = pnand %p1574_p11, %p2516_p8 }
 0x236   : > { %p1571_p0 = pneg %p1570_p9 }
 0x238   : > { %1722 = dma.done.wait (%p1571_p0), %s1454_s26, 64  }
 0x239   : > { %1724 = vsyncadd (%p1571_p0), %s1454_s26, 4294967232  ;;  %p19_p2 = scmp.ge.s32.totalorder %s1793_s18, 6   ;;  %s2517_s12 = smov %s1731_s13 }
 0x23a   : > { %s2518_s13 = smov %s1735_s14  ;;  %s2519_s14 = smov %s1805_s21 }
 0x23b   : > { %s2520_s15 = smov %s1793_s18  ;;  %21 = sbr.rel (!%p19_p2) target bundleno = 7 (0x7), region = 90 }
 0x240   :  { %1459 = vsyncpa [#allocation3], 1 }
 0x241   :  { %1461 = vsyncpa [#allocation3 + $0x1], 1 }
 0x242   :  { %1462 = vsyncpa [#allocation6], 1 }
 0x243   :  { %1464 = vsyncpa [#allocation6 + $0x1], 1 }
 0x244   :  { %1465 = vsyncpa [#allocation4], 1 }
 0x245   :  { %1467 = vsyncpa [#allocation4 + $0x1], 1 }

</bundles_post_ra>
